<compile_context>
chip_gen: v6e
topology: v6e:2x2x1
jax: 0.10.0
libtpu: 0.0.40
codegen_flags: <defaults>
</compile_context>

<pallas_src>
import functools

import jax
import jax.numpy as jnp
from jax import lax
from jax.experimental import pallas as pl
from jax.experimental.pallas import tpu as pltpu


# ---------------- ConvE hyper-parameters (small synthetic config) ----------
ENTITY_DIM = 32
RELATION_DIM = 32
EMB_2D_D1 = 4
EMB_2D_D2 = 8
NUM_OUT_CHANNELS = 4
KERNEL_SIZE = 3
NUM_ENTITIES = 16
NUM_RELATIONS = 8
BATCH = 2

H_IN = 2 * EMB_2D_D1                    # stacked [E1; R] along the "height" axis
W_IN = EMB_2D_D2
H_OUT = H_IN - KERNEL_SIZE + 1
W_OUT = W_IN - KERNEL_SIZE + 1
N_POS = H_OUT * W_OUT                   # spatial output positions
KK = KERNEL_SIZE * KERNEL_SIZE
FEAT_DIM = NUM_OUT_CHANNELS * N_POS
BN_EPS = 1e-5

# Lane-dense padding (multiples of 128 on the lane axis).
E_PAD = 128                             # padded hidden / entity-embedding dim
NE_TILE = 128                           # entity tile width (lane-dense)
NE_PAD = ((NUM_ENTITIES + NE_TILE - 1) // NE_TILE) * NE_TILE

assert EMB_2D_D1 * EMB_2D_D2 == ENTITY_DIM
assert EMB_2D_D1 * EMB_2D_D2 == RELATION_DIM


# ---------------- Fused kernel: conv+fc accumulation -> ReLU -> E2^T+b -> sigmoid
def _conve_kernel(patches_ref, convw_ref, convb_ref, fcw_ref, fcb_ref,
                  e2t_ref, outb_ref, out_ref, *, n_pos):
    # patches_ref: (P, B, KK)        bf16  im2col slab, one (B, KK) slab per position
    # convw_ref:   (KK, C)           bf16  bn0-folded conv weights
    # convb_ref:   (1, C)            f32   bn0-folded conv bias
    # fcw_ref:     (P, C, E_PAD)     bf16  bn2-folded fc weights, (p, c)-ordered, E padded
    # fcb_ref:     (1, E_PAD)        f32   bn2-folded fc bias (zero in padding)
    # e2t_ref:     (E_PAD, NE_TILE)  bf16  entity-table tile (transposed, zero-padded rows)
    # outb_ref:    (1, NE_TILE)      f32   `b` parameter tile
    # out_ref:     (B, NE_TILE)      f32   sigmoid scores tile (lane-dense)
    B = patches_ref.shape[1]
    convw = convw_ref[...]                                   # (KK, C)
    convb = convb_ref[...]                                   # (1, C)

    # conv1 + ReLU fused into the fc contraction: h[b,e] = sum_p relu(x_p@Wc+bc) @ Wfc[p]
    h = jnp.zeros((B, fcw_ref.shape[2]), dtype=jnp.float32)
    for p in range(n_pos):                                   # P=12, fully unrolled
        cp = jnp.dot(patches_ref[p], convw,
                     preferred_element_type=jnp.float32)     # (B, C)  MXU
        cp = jnp.maximum(cp + convb, 0.0)                    # conv bias + ReLU (f32)
        h = h + jnp.dot(cp.astype(jnp.bfloat16), fcw_ref[p],
                        preferred_element_type=jnp.float32)  # (B, E_PAD)  MXU

    # fc bias (bn2 folded) + ReLU
    h = jnp.maximum(h + fcb_ref[...], 0.0)                   # (B, E_PAD), padding stays 0

    # X @ E2^T + b, sigmoid  (lane-dense 128-wide entity tile)
    logits = jnp.dot(h.astype(jnp.bfloat16), e2t_ref[...],
                     preferred_element_type=jnp.float32) + outb_ref[...]
    out_ref[...] = jax.nn.sigmoid(logits)


# ---------------- One-time parameter preparation (hoisted out of the forward) ----
def prepare_conve_params(params):
    f32 = jnp.float32
    ent = params["entity_emb"].astype(f32)                   # (NE, E)
    rel = params["relation_emb"].astype(f32)

    # Fold bn0 (BatchNorm2d(1), eval) into the conv weights/bias:
    #   conv(s*x + t) = (s*W) (*) x + (bias + t*sum(W))
    scale0 = params["bn0_gamma"] / jnp.sqrt(params["bn0_var"] + BN_EPS)
    shift0 = params["bn0_beta"] - params["bn0_mean"] * scale0
    w2d = params["conv_w"].reshape(NUM_OUT_CHANNELS, KK).astype(f32)      # (C, KK)
    convw = (w2d * scale0).T.astype(jnp.bfloat16)                          # (KK, C) bf16
    convb = (params["conv_b"].astype(f32)
             + shift0 * jnp.sum(w2d, axis=1)).reshape(1, NUM_OUT_CHANNELS)  # (1, C) f32

    # Fold bn2 (BatchNorm1d(entity_dim), eval) into fc:
    #   bn2(feat @ W.T + b) = feat @ (W.T * s2) + (b*s2 + t2)
    scale2 = params["bn2_gamma"] / jnp.sqrt(params["bn2_var"] + BN_EPS)
    shift2 = params["bn2_beta"] - params["bn2_mean"] * scale2
    fcw2 = (params["fc_w"].T * scale2[None, :]).astype(f32)                # (FEAT, E)
    # Permute rows from PyTorch view() order (c*P + p) to kernel order (p, c); pad E.
    fcw3 = fcw2.reshape(NUM_OUT_CHANNELS, N_POS, ENTITY_DIM).transpose(1, 0, 2)
    fcw3 = jnp.pad(fcw3, ((0, 0), (0, 0), (0, E_PAD - ENTITY_DIM))).astype(jnp.bfloat16)
    fcb = (params["fc_b"] * scale2 + shift2).astype(f32)
    fcb = jnp.pad(fcb, (0, E_PAD - ENTITY_DIM)).reshape(1, E_PAD)          # (1, E_PAD) f32

    # Entity table transposed, zero-padded, bf16 — built ONCE, reused every forward.
    e2t = jnp.pad(ent.T, ((0, E_PAD - ENTITY_DIM),
                          (0, NE_PAD - NUM_ENTITIES))).astype(jnp.bfloat16)  # (E_PAD, NE_PAD)
    outb = jnp.pad(params["b"].astype(f32),
                   (0, NE_PAD - NUM_ENTITIES)).reshape(1, NE_PAD)            # (1, NE_PAD) f32

    return {"entity_emb": ent, "relation_emb": rel, "convw": convw, "convb": convb,
            "fcw": fcw3, "fcb": fcb, "e2t": e2t, "outb": outb}


# ---------------- Forward wrapper ------------------------------------------------
def conve_forward(e1, r, prep):
    E1 = prep["entity_emb"][e1].reshape(-1, EMB_2D_D1, EMB_2D_D2)
    R = prep["relation_emb"][r].reshape(-1, EMB_2D_D1, EMB_2D_D2)
    stacked = jnp.concatenate([E1, R], axis=1)               # (B, H_IN, W_IN)
    B = stacked.shape[0]

    # im2col: one (B, K*K) slab per output position, stacked along the leading axis
    # so the kernel indexes the un-tiled dim (no lane-offset masked slices).
    slabs = []
    for ho in range(H_OUT):
        for wo in range(W_OUT):
            slabs.append(stacked[:, ho:ho + KERNEL_SIZE, wo:wo + KERNEL_SIZE]
                         .reshape(B, KK))
    patches = jnp.stack(slabs, axis=0).astype(jnp.bfloat16)  # (P, B, KK) bf16

    # HiddenDropout / FeatureDropout: identity at inference.
    out = pl.pallas_call(
        functools.partial(_conve_kernel, n_pos=N_POS),
        out_shape=jax.ShapeDtypeStruct((B, NE_PAD), jnp.float32),
        grid_spec=pltpu.PrefetchScalarGridSpec(
            num_scalar_prefetch=0,
            grid=(NE_PAD // NE_TILE,),                       # entity-tile axis (parallel)
            in_specs=[
                pl.BlockSpec((N_POS, B, KK), lambda j: (0, 0, 0)),                # patches
                pl.BlockSpec((KK, NUM_OUT_CHANNELS), lambda j: (0, 0)),           # conv W
                pl.BlockSpec((1, NUM_OUT_CHANNELS), lambda j: (0, 0)),            # conv b
                pl.BlockSpec((N_POS, NUM_OUT_CHANNELS, E_PAD), lambda j: (0, 0, 0)),  # fc W
                pl.BlockSpec((1, E_PAD), lambda j: (0, 0)),                        # fc b
                pl.BlockSpec((E_PAD, NE_TILE), lambda j: (0, j)),                  # E2^T tile
                pl.BlockSpec((1, NE_TILE), lambda j: (0, j)),                      # b tile
            ],
            out_specs=pl.BlockSpec((B, NE_TILE), lambda j: (0, j)),
        ),
        compiler_params=pltpu.CompilerParams(
            dimension_semantics=("parallel",),               # lets v7x split entity tiles
            vmem_limit_bytes=32 * 1024 * 1024,
        ),
    )(patches, prep["convw"], prep["convb"], prep["fcw"], prep["fcb"],
      prep["e2t"], prep["outb"])
    return out[:, :NUM_ENTITIES]


# ---------------- Pure-JAX f32 reference (for correctness check) -----------------
def conve_forward_ref(e1, r, params):
    ent = params["entity_emb"]
    rel = params["relation_emb"]
    E1 = ent[e1].reshape(-1, 1, EMB_2D_D1, EMB_2D_D2)
    R = rel[r].reshape(-1, 1, EMB_2D_D1, EMB_2D_D2)
    x = jnp.concatenate([E1, R], axis=2)
    scale0 = params["bn0_gamma"] / jnp.sqrt(params["bn0_var"] + BN_EPS)
    shift0 = params["bn0_beta"] - params["bn0_mean"] * scale0
    x = x * scale0 + shift0
    x = lax.conv_general_dilated(x, params["conv_w"], (1, 1), "VALID",
                                 dimension_numbers=("NCHW", "OIHW", "NCHW"))
    x = x + params["conv_b"].reshape(1, -1, 1, 1)
    x = jnp.maximum(x, 0.0)
    x = x.reshape(x.shape[0], -1)
    x = x @ params["fc_w"].T + params["fc_b"]
    scale2 = params["bn2_gamma"] / jnp.sqrt(params["bn2_var"] + BN_EPS)
    shift2 = params["bn2_beta"] - params["bn2_mean"] * scale2
    x = x * scale2 + shift2
    x = jnp.maximum(x, 0.0)
    x = x @ ent.T + params["b"]
    return jax.nn.sigmoid(x)


if __name__ == "__main__":
    key = jax.random.PRNGKey(0)
    ks = jax.random.split(key, 10)
    params = {
        "entity_emb": 0.5 * jax.random.normal(ks[0], (NUM_ENTITIES, ENTITY_DIM), jnp.float32),
        "relation_emb": 0.5 * jax.random.normal(ks[1], (NUM_RELATIONS, RELATION_DIM), jnp.float32),
        "conv_w": 0.3 * jax.random.normal(ks[2], (NUM_OUT_CHANNELS, 1, KERNEL_SIZE, KERNEL_SIZE), jnp.float32),
        "conv_b": 0.1 * jax.random.normal(ks[3], (NUM_OUT_CHANNELS,), jnp.float32),
        "fc_w": 0.1 * jax.random.normal(ks[4], (ENTITY_DIM, FEAT_DIM), jnp.float32),
        "fc_b": 0.1 * jax.random.normal(ks[5], (ENTITY_DIM,), jnp.float32),
        # bn0 (BatchNorm2d(1)) eval-mode stats/affine
        "bn0_gamma": jnp.float32(1.1),
        "bn0_beta": jnp.float32(0.05),
        "bn0_mean": jnp.float32(0.02),
        "bn0_var": jnp.float32(0.9),
        # bn2 (BatchNorm1d(entity_dim)) eval-mode stats/affine
        "bn2_gamma": jax.random.uniform(ks[6], (ENTITY_DIM,), jnp.float32, 0.5, 1.5),
        "bn2_beta": 0.1 * jax.random.normal(ks[7], (ENTITY_DIM,), jnp.float32),
        "bn2_mean": 0.1 * jax.random.normal(ks[8], (ENTITY_DIM,), jnp.float32),
        "bn2_var": jax.random.uniform(ks[9], (ENTITY_DIM,), jnp.float32, 0.5, 1.5),
        # self.b = nn.Parameter(torch.zeros(num_entities))
        "b": jnp.zeros((NUM_ENTITIES,), jnp.float32),
    }

    e1 = jnp.array([0, 3], dtype=jnp.int32)
    r = jnp.array([1, 5], dtype=jnp.int32)

    prep = prepare_conve_params(params)          # one-time: BN folds, permute, pad, bf16, E2^T
    out = conve_forward(e1, r, prep)
    out = jax.block_until_ready(out)

    ref = conve_forward_ref(e1, r, params)       # pure f32 reference
    assert out.shape == (BATCH, NUM_ENTITIES), out.shape
    # Tolerance accounts for bf16 MXU operands (accumulation and epilogue stay f32).
    assert jnp.allclose(out, ref, atol=2e-2, rtol=2e-2), (out, ref)
    print("KERNEL_OK")
</pallas_src>

<mosaic_0001>
module attributes {stable_mosaic.version = 11 : i64} {
  func.func @_conve_kernel(%arg0: i32, %arg1: memref<36x2x9xbf16, #tpu.memory_space<vmem>>, %arg2: memref<9x4xbf16, #tpu.memory_space<vmem>>, %arg3: memref<1x4xf32, #tpu.memory_space<vmem>>, %arg4: memref<36x4x128xbf16, #tpu.memory_space<vmem>>, %arg5: memref<1x128xf32, #tpu.memory_space<vmem>>, %arg6: memref<128x128xbf16, #tpu.memory_space<vmem>>, %arg7: memref<1x128xf32, #tpu.memory_space<vmem>>, %arg8: memref<2x128xf32, #tpu.memory_space<vmem>>) attributes {dimension_semantics = [#tpu.dimension_semantics<parallel>], iteration_bounds = array<i64: 1>, scalar_prefetch = 0 : i64, scratch_operands = 0 : i64, tpu.core_type = #tpu.core_type<tc>, window_params = [{pipeline_mode = #tpu.pipeline_mode<synchronous>, transform_indices = @transform_0, window_bounds = array<i64: 36, 2, 9>}, {pipeline_mode = #tpu.pipeline_mode<synchronous>, transform_indices = @transform_1, window_bounds = array<i64: 9, 4>}, {pipeline_mode = #tpu.pipeline_mode<synchronous>, transform_indices = @transform_2, window_bounds = array<i64: 1, 4>}, {pipeline_mode = #tpu.pipeline_mode<synchronous>, transform_indices = @transform_3, window_bounds = array<i64: 36, 4, 128>}, {pipeline_mode = #tpu.pipeline_mode<synchronous>, transform_indices = @transform_4, window_bounds = array<i64: 1, 128>}, {transform_indices = @transform_5, window_bounds = array<i64: 128, 128>}, {transform_indices = @transform_6, window_bounds = array<i64: 1, 128>}, {transform_indices = @transform_7, window_bounds = array<i64: 2, 128>}]} {
    %c0 = arith.constant 0 : index
    %c0_0 = arith.constant 0 : index
    %0 = vector.load %arg2[%c0, %c0_0] : memref<9x4xbf16, #tpu.memory_space<vmem>>, vector<9x4xbf16>
    %c0_1 = arith.constant 0 : index
    %c0_2 = arith.constant 0 : index
    %1 = vector.load %arg3[%c0_1, %c0_2] : memref<1x4xf32, #tpu.memory_space<vmem>>, vector<1x4xf32>
    %cst = arith.constant 0.000000e+00 : f32
    %2 = vector.broadcast %cst : f32 to vector<2x128xf32>
    %c0_3 = arith.constant 0 : index
    %c0_4 = arith.constant 0 : index
    %c0_5 = arith.constant 0 : index
    %3 = vector.load %arg1[%c0_3, %c0_4, %c0_5] : memref<36x2x9xbf16, #tpu.memory_space<vmem>>, vector<1x2x9xbf16>
    %4 = vector.shape_cast %3 : vector<1x2x9xbf16> to vector<2x9xbf16>
    %cst_6 = arith.constant dense<0.000000e+00> : vector<2x4xf32>
    %5 = tpu.matmul %4, %0, %cst_6 {dimension_numbers = #tpu.dot_dimension_numbers<[1], [0], [0], [1], [0, 0, 1, 1], [], []>} : vector<2x9xbf16>, vector<9x4xbf16>, vector<2x4xf32> -> vector<2x4xf32>
    %6 = vector.broadcast %1 : vector<1x4xf32> to vector<2x4xf32>
    %7 = arith.addf %5, %6 : vector<2x4xf32>
    %cst_7 = arith.constant 0.000000e+00 : f32
    %8 = vector.broadcast %cst_7 : f32 to vector<2x4xf32>
    %9 = arith.maximumf %7, %8 : vector<2x4xf32>
    %10 = arith.truncf %9 : vector<2x4xf32> to vector<2x4xbf16>
    %c0_8 = arith.constant 0 : index
    %c0_9 = arith.constant 0 : index
    %c0_10 = arith.constant 0 : index
    %11 = vector.load %arg4[%c0_8, %c0_9, %c0_10] : memref<36x4x128xbf16, #tpu.memory_space<vmem>>, vector<1x4x128xbf16>
    %12 = vector.shape_cast %11 : vector<1x4x128xbf16> to vector<4x128xbf16>
    %cst_11 = arith.constant dense<0.000000e+00> : vector<2x128xf32>
    %13 = tpu.matmul %10, %12, %cst_11 {dimension_numbers = #tpu.dot_dimension_numbers<[1], [0], [0], [1], [0, 0, 1, 1], [], []>} : vector<2x4xbf16>, vector<4x128xbf16>, vector<2x128xf32> -> vector<2x128xf32>
    %14 = arith.addf %2, %13 : vector<2x128xf32>
    %c1 = arith.constant 1 : index
    %c0_12 = arith.constant 0 : index
    %c0_13 = arith.constant 0 : index
    %15 = vector.load %arg1[%c1, %c0_12, %c0_13] : memref<36x2x9xbf16, #tpu.memory_space<vmem>>, vector<1x2x9xbf16>
    %16 = vector.shape_cast %15 : vector<1x2x9xbf16> to vector<2x9xbf16>
    %cst_14 = arith.constant dense<0.000000e+00> : vector<2x4xf32>
    %17 = tpu.matmul %16, %0, %cst_14 {dimension_numbers = #tpu.dot_dimension_numbers<[1], [0], [0], [1], [0, 0, 1, 1], [], []>} : vector<2x9xbf16>, vector<9x4xbf16>, vector<2x4xf32> -> vector<2x4xf32>
    %18 = vector.broadcast %1 : vector<1x4xf32> to vector<2x4xf32>
    %19 = arith.addf %17, %18 : vector<2x4xf32>
    %cst_15 = arith.constant 0.000000e+00 : f32
    %20 = vector.broadcast %cst_15 : f32 to vector<2x4xf32>
    %21 = arith.maximumf %19, %20 : vector<2x4xf32>
    %22 = arith.truncf %21 : vector<2x4xf32> to vector<2x4xbf16>
    %c1_16 = arith.constant 1 : index
    %c0_17 = arith.constant 0 : index
    %c0_18 = arith.constant 0 : index
    %23 = vector.load %arg4[%c1_16, %c0_17, %c0_18] : memref<36x4x128xbf16, #tpu.memory_space<vmem>>, vector<1x4x128xbf16>
    %24 = vector.shape_cast %23 : vector<1x4x128xbf16> to vector<4x128xbf16>
    %cst_19 = arith.constant dense<0.000000e+00> : vector<2x128xf32>
    %25 = tpu.matmul %22, %24, %cst_19 {dimension_numbers = #tpu.dot_dimension_numbers<[1], [0], [0], [1], [0, 0, 1, 1], [], []>} : vector<2x4xbf16>, vector<4x128xbf16>, vector<2x128xf32> -> vector<2x128xf32>
    %26 = arith.addf %14, %25 : vector<2x128xf32>
    %c2 = arith.constant 2 : index
    %c0_20 = arith.constant 0 : index
    %c0_21 = arith.constant 0 : index
    %27 = vector.load %arg1[%c2, %c0_20, %c0_21] : memref<36x2x9xbf16, #tpu.memory_space<vmem>>, vector<1x2x9xbf16>
    %28 = vector.shape_cast %27 : vector<1x2x9xbf16> to vector<2x9xbf16>
    %cst_22 = arith.constant dense<0.000000e+00> : vector<2x4xf32>
    %29 = tpu.matmul %28, %0, %cst_22 {dimension_numbers = #tpu.dot_dimension_numbers<[1], [0], [0], [1], [0, 0, 1, 1], [], []>} : vector<2x9xbf16>, vector<9x4xbf16>, vector<2x4xf32> -> vector<2x4xf32>
    %30 = vector.broadcast %1 : vector<1x4xf32> to vector<2x4xf32>
    %31 = arith.addf %29, %30 : vector<2x4xf32>
    %cst_23 = arith.constant 0.000000e+00 : f32
    %32 = vector.broadcast %cst_23 : f32 to vector<2x4xf32>
    %33 = arith.maximumf %31, %32 : vector<2x4xf32>
    %34 = arith.truncf %33 : vector<2x4xf32> to vector<2x4xbf16>
    %c2_24 = arith.constant 2 : index
    %c0_25 = arith.constant 0 : index
    %c0_26 = arith.constant 0 : index
    %35 = vector.load %arg4[%c2_24, %c0_25, %c0_26] : memref<36x4x128xbf16, #tpu.memory_space<vmem>>, vector<1x4x128xbf16>
    %36 = vector.shape_cast %35 : vector<1x4x128xbf16> to vector<4x128xbf16>
    %cst_27 = arith.constant dense<0.000000e+00> : vector<2x128xf32>
    %37 = tpu.matmul %34, %36, %cst_27 {dimension_numbers = #tpu.dot_dimension_numbers<[1], [0], [0], [1], [0, 0, 1, 1], [], []>} : vector<2x4xbf16>, vector<4x128xbf16>, vector<2x128xf32> -> vector<2x128xf32>
    %38 = arith.addf %26, %37 : vector<2x128xf32>
    %c3 = arith.constant 3 : index
    %c0_28 = arith.constant 0 : index
    %c0_29 = arith.constant 0 : index
    %39 = vector.load %arg1[%c3, %c0_28, %c0_29] : memref<36x2x9xbf16, #tpu.memory_space<vmem>>, vector<1x2x9xbf16>
    %40 = vector.shape_cast %39 : vector<1x2x9xbf16> to vector<2x9xbf16>
    %cst_30 = arith.constant dense<0.000000e+00> : vector<2x4xf32>
    %41 = tpu.matmul %40, %0, %cst_30 {dimension_numbers = #tpu.dot_dimension_numbers<[1], [0], [0], [1], [0, 0, 1, 1], [], []>} : vector<2x9xbf16>, vector<9x4xbf16>, vector<2x4xf32> -> vector<2x4xf32>
    %42 = vector.broadcast %1 : vector<1x4xf32> to vector<2x4xf32>
    %43 = arith.addf %41, %42 : vector<2x4xf32>
    %cst_31 = arith.constant 0.000000e+00 : f32
    %44 = vector.broadcast %cst_31 : f32 to vector<2x4xf32>
    %45 = arith.maximumf %43, %44 : vector<2x4xf32>
    %46 = arith.truncf %45 : vector<2x4xf32> to vector<2x4xbf16>
    %c3_32 = arith.constant 3 : index
    %c0_33 = arith.constant 0 : index
    %c0_34 = arith.constant 0 : index
    %47 = vector.load %arg4[%c3_32, %c0_33, %c0_34] : memref<36x4x128xbf16, #tpu.memory_space<vmem>>, vector<1x4x128xbf16>
    %48 = vector.shape_cast %47 : vector<1x4x128xbf16> to vector<4x128xbf16>
    %cst_35 = arith.constant dense<0.000000e+00> : vector<2x128xf32>
    %49 = tpu.matmul %46, %48, %cst_35 {dimension_numbers = #tpu.dot_dimension_numbers<[1], [0], [0], [1], [0, 0, 1, 1], [], []>} : vector<2x4xbf16>, vector<4x128xbf16>, vector<2x128xf32> -> vector<2x128xf32>
    %50 = arith.addf %38, %49 : vector<2x128xf32>
    %c4 = arith.constant 4 : index
    %c0_36 = arith.constant 0 : index
    %c0_37 = arith.constant 0 : index
    %51 = vector.load %arg1[%c4, %c0_36, %c0_37] : memref<36x2x9xbf16, #tpu.memory_space<vmem>>, vector<1x2x9xbf16>
    %52 = vector.shape_cast %51 : vector<1x2x9xbf16> to vector<2x9xbf16>
    %cst_38 = arith.constant dense<0.000000e+00> : vector<2x4xf32>
    %53 = tpu.matmul %52, %0, %cst_38 {dimension_numbers = #tpu.dot_dimension_numbers<[1], [0], [0], [1], [0, 0, 1, 1], [], []>} : vector<2x9xbf16>, vector<9x4xbf16>, vector<2x4xf32> -> vector<2x4xf32>
    %54 = vector.broadcast %1 : vector<1x4xf32> to vector<2x4xf32>
    %55 = arith.addf %53, %54 : vector<2x4xf32>
    %cst_39 = arith.constant 0.000000e+00 : f32
    %56 = vector.broadcast %cst_39 : f32 to vector<2x4xf32>
    %57 = arith.maximumf %55, %56 : vector<2x4xf32>
    %58 = arith.truncf %57 : vector<2x4xf32> to vector<2x4xbf16>
    %c4_40 = arith.constant 4 : index
    %c0_41 = arith.constant 0 : index
    %c0_42 = arith.constant 0 : index
    %59 = vector.load %arg4[%c4_40, %c0_41, %c0_42] : memref<36x4x128xbf16, #tpu.memory_space<vmem>>, vector<1x4x128xbf16>
    %60 = vector.shape_cast %59 : vector<1x4x128xbf16> to vector<4x128xbf16>
    %cst_43 = arith.constant dense<0.000000e+00> : vector<2x128xf32>
    %61 = tpu.matmul %58, %60, %cst_43 {dimension_numbers = #tpu.dot_dimension_numbers<[1], [0], [0], [1], [0, 0, 1, 1], [], []>} : vector<2x4xbf16>, vector<4x128xbf16>, vector<2x128xf32> -> vector<2x128xf32>
    %62 = arith.addf %50, %61 : vector<2x128xf32>
    %c5 = arith.constant 5 : index
    %c0_44 = arith.constant 0 : index
    %c0_45 = arith.constant 0 : index
    %63 = vector.load %arg1[%c5, %c0_44, %c0_45] : memref<36x2x9xbf16, #tpu.memory_space<vmem>>, vector<1x2x9xbf16>
    %64 = vector.shape_cast %63 : vector<1x2x9xbf16> to vector<2x9xbf16>
    %cst_46 = arith.constant dense<0.000000e+00> : vector<2x4xf32>
    %65 = tpu.matmul %64, %0, %cst_46 {dimension_numbers = #tpu.dot_dimension_numbers<[1], [0], [0], [1], [0, 0, 1, 1], [], []>} : vector<2x9xbf16>, vector<9x4xbf16>, vector<2x4xf32> -> vector<2x4xf32>
    %66 = vector.broadcast %1 : vector<1x4xf32> to vector<2x4xf32>
    %67 = arith.addf %65, %66 : vector<2x4xf32>
    %cst_47 = arith.constant 0.000000e+00 : f32
    %68 = vector.broadcast %cst_47 : f32 to vector<2x4xf32>
    %69 = arith.maximumf %67, %68 : vector<2x4xf32>
    %70 = arith.truncf %69 : vector<2x4xf32> to vector<2x4xbf16>
    %c5_48 = arith.constant 5 : index
    %c0_49 = arith.constant 0 : index
    %c0_50 = arith.constant 0 : index
    %71 = vector.load %arg4[%c5_48, %c0_49, %c0_50] : memref<36x4x128xbf16, #tpu.memory_space<vmem>>, vector<1x4x128xbf16>
    %72 = vector.shape_cast %71 : vector<1x4x128xbf16> to vector<4x128xbf16>
    %cst_51 = arith.constant dense<0.000000e+00> : vector<2x128xf32>
    %73 = tpu.matmul %70, %72, %cst_51 {dimension_numbers = #tpu.dot_dimension_numbers<[1], [0], [0], [1], [0, 0, 1, 1], [], []>} : vector<2x4xbf16>, vector<4x128xbf16>, vector<2x128xf32> -> vector<2x128xf32>
    %74 = arith.addf %62, %73 : vector<2x128xf32>
    %c6 = arith.constant 6 : index
    %c0_52 = arith.constant 0 : index
    %c0_53 = arith.constant 0 : index
    %75 = vector.load %arg1[%c6, %c0_52, %c0_53] : memref<36x2x9xbf16, #tpu.memory_space<vmem>>, vector<1x2x9xbf16>
    %76 = vector.shape_cast %75 : vector<1x2x9xbf16> to vector<2x9xbf16>
    %cst_54 = arith.constant dense<0.000000e+00> : vector<2x4xf32>
    %77 = tpu.matmul %76, %0, %cst_54 {dimension_numbers = #tpu.dot_dimension_numbers<[1], [0], [0], [1], [0, 0, 1, 1], [], []>} : vector<2x9xbf16>, vector<9x4xbf16>, vector<2x4xf32> -> vector<2x4xf32>
    %78 = vector.broadcast %1 : vector<1x4xf32> to vector<2x4xf32>
    %79 = arith.addf %77, %78 : vector<2x4xf32>
    %cst_55 = arith.constant 0.000000e+00 : f32
    %80 = vector.broadcast %cst_55 : f32 to vector<2x4xf32>
    %81 = arith.maximumf %79, %80 : vector<2x4xf32>
    %82 = arith.truncf %81 : vector<2x4xf32> to vector<2x4xbf16>
    %c6_56 = arith.constant 6 : index
    %c0_57 = arith.constant 0 : index
    %c0_58 = arith.constant 0 : index
    %83 = vector.load %arg4[%c6_56, %c0_57, %c0_58] : memref<36x4x128xbf16, #tpu.memory_space<vmem>>, vector<1x4x128xbf16>
    %84 = vector.shape_cast %83 : vector<1x4x128xbf16> to vector<4x128xbf16>
    %cst_59 = arith.constant dense<0.000000e+00> : vector<2x128xf32>
    %85 = tpu.matmul %82, %84, %cst_59 {dimension_numbers = #tpu.dot_dimension_numbers<[1], [0], [0], [1], [0, 0, 1, 1], [], []>} : vector<2x4xbf16>, vector<4x128xbf16>, vector<2x128xf32> -> vector<2x128xf32>
    %86 = arith.addf %74, %85 : vector<2x128xf32>
    %c7 = arith.constant 7 : index
    %c0_60 = arith.constant 0 : index
    %c0_61 = arith.constant 0 : index
    %87 = vector.load %arg1[%c7, %c0_60, %c0_61] : memref<36x2x9xbf16, #tpu.memory_space<vmem>>, vector<1x2x9xbf16>
    %88 = vector.shape_cast %87 : vector<1x2x9xbf16> to vector<2x9xbf16>
    %cst_62 = arith.constant dense<0.000000e+00> : vector<2x4xf32>
    %89 = tpu.matmul %88, %0, %cst_62 {dimension_numbers = #tpu.dot_dimension_numbers<[1], [0], [0], [1], [0, 0, 1, 1], [], []>} : vector<2x9xbf16>, vector<9x4xbf16>, vector<2x4xf32> -> vector<2x4xf32>
    %90 = vector.broadcast %1 : vector<1x4xf32> to vector<2x4xf32>
    %91 = arith.addf %89, %90 : vector<2x4xf32>
    %cst_63 = arith.constant 0.000000e+00 : f32
    %92 = vector.broadcast %cst_63 : f32 to vector<2x4xf32>
    %93 = arith.maximumf %91, %92 : vector<2x4xf32>
    %94 = arith.truncf %93 : vector<2x4xf32> to vector<2x4xbf16>
    %c7_64 = arith.constant 7 : index
    %c0_65 = arith.constant 0 : index
    %c0_66 = arith.constant 0 : index
    %95 = vector.load %arg4[%c7_64, %c0_65, %c0_66] : memref<36x4x128xbf16, #tpu.memory_space<vmem>>, vector<1x4x128xbf16>
    %96 = vector.shape_cast %95 : vector<1x4x128xbf16> to vector<4x128xbf16>
    %cst_67 = arith.constant dense<0.000000e+00> : vector<2x128xf32>
    %97 = tpu.matmul %94, %96, %cst_67 {dimension_numbers = #tpu.dot_dimension_numbers<[1], [0], [0], [1], [0, 0, 1, 1], [], []>} : vector<2x4xbf16>, vector<4x128xbf16>, vector<2x128xf32> -> vector<2x128xf32>
    %98 = arith.addf %86, %97 : vector<2x128xf32>
    %c8 = arith.constant 8 : index
    %c0_68 = arith.constant 0 : index
    %c0_69 = arith.constant 0 : index
    %99 = vector.load %arg1[%c8, %c0_68, %c0_69] : memref<36x2x9xbf16, #tpu.memory_space<vmem>>, vector<1x2x9xbf16>
    %100 = vector.shape_cast %99 : vector<1x2x9xbf16> to vector<2x9xbf16>
    %cst_70 = arith.constant dense<0.000000e+00> : vector<2x4xf32>
    %101 = tpu.matmul %100, %0, %cst_70 {dimension_numbers = #tpu.dot_dimension_numbers<[1], [0], [0], [1], [0, 0, 1, 1], [], []>} : vector<2x9xbf16>, vector<9x4xbf16>, vector<2x4xf32> -> vector<2x4xf32>
    %102 = vector.broadcast %1 : vector<1x4xf32> to vector<2x4xf32>
    %103 = arith.addf %101, %102 : vector<2x4xf32>
    %cst_71 = arith.constant 0.000000e+00 : f32
    %104 = vector.broadcast %cst_71 : f32 to vector<2x4xf32>
    %105 = arith.maximumf %103, %104 : vector<2x4xf32>
    %106 = arith.truncf %105 : vector<2x4xf32> to vector<2x4xbf16>
    %c8_72 = arith.constant 8 : index
    %c0_73 = arith.constant 0 : index
    %c0_74 = arith.constant 0 : index
    %107 = vector.load %arg4[%c8_72, %c0_73, %c0_74] : memref<36x4x128xbf16, #tpu.memory_space<vmem>>, vector<1x4x128xbf16>
    %108 = vector.shape_cast %107 : vector<1x4x128xbf16> to vector<4x128xbf16>
    %cst_75 = arith.constant dense<0.000000e+00> : vector<2x128xf32>
    %109 = tpu.matmul %106, %108, %cst_75 {dimension_numbers = #tpu.dot_dimension_numbers<[1], [0], [0], [1], [0, 0, 1, 1], [], []>} : vector<2x4xbf16>, vector<4x128xbf16>, vector<2x128xf32> -> vector<2x128xf32>
    %110 = arith.addf %98, %109 : vector<2x128xf32>
    %c9 = arith.constant 9 : index
    %c0_76 = arith.constant 0 : index
    %c0_77 = arith.constant 0 : index
    %111 = vector.load %arg1[%c9, %c0_76, %c0_77] : memref<36x2x9xbf16, #tpu.memory_space<vmem>>, vector<1x2x9xbf16>
    %112 = vector.shape_cast %111 : vector<1x2x9xbf16> to vector<2x9xbf16>
    %cst_78 = arith.constant dense<0.000000e+00> : vector<2x4xf32>
    %113 = tpu.matmul %112, %0, %cst_78 {dimension_numbers = #tpu.dot_dimension_numbers<[1], [0], [0], [1], [0, 0, 1, 1], [], []>} : vector<2x9xbf16>, vector<9x4xbf16>, vector<2x4xf32> -> vector<2x4xf32>
    %114 = vector.broadcast %1 : vector<1x4xf32> to vector<2x4xf32>
    %115 = arith.addf %113, %114 : vector<2x4xf32>
    %cst_79 = arith.constant 0.000000e+00 : f32
    %116 = vector.broadcast %cst_79 : f32 to vector<2x4xf32>
    %117 = arith.maximumf %115, %116 : vector<2x4xf32>
    %118 = arith.truncf %117 : vector<2x4xf32> to vector<2x4xbf16>
    %c9_80 = arith.constant 9 : index
    %c0_81 = arith.constant 0 : index
    %c0_82 = arith.constant 0 : index
    %119 = vector.load %arg4[%c9_80, %c0_81, %c0_82] : memref<36x4x128xbf16, #tpu.memory_space<vmem>>, vector<1x4x128xbf16>
    %120 = vector.shape_cast %119 : vector<1x4x128xbf16> to vector<4x128xbf16>
    %cst_83 = arith.constant dense<0.000000e+00> : vector<2x128xf32>
    %121 = tpu.matmul %118, %120, %cst_83 {dimension_numbers = #tpu.dot_dimension_numbers<[1], [0], [0], [1], [0, 0, 1, 1], [], []>} : vector<2x4xbf16>, vector<4x128xbf16>, vector<2x128xf32> -> vector<2x128xf32>
    %122 = arith.addf %110, %121 : vector<2x128xf32>
    %c10 = arith.constant 10 : index
    %c0_84 = arith.constant 0 : index
    %c0_85 = arith.constant 0 : index
    %123 = vector.load %arg1[%c10, %c0_84, %c0_85] : memref<36x2x9xbf16, #tpu.memory_space<vmem>>, vector<1x2x9xbf16>
    %124 = vector.shape_cast %123 : vector<1x2x9xbf16> to vector<2x9xbf16>
    %cst_86 = arith.constant dense<0.000000e+00> : vector<2x4xf32>
    %125 = tpu.matmul %124, %0, %cst_86 {dimension_numbers = #tpu.dot_dimension_numbers<[1], [0], [0], [1], [0, 0, 1, 1], [], []>} : vector<2x9xbf16>, vector<9x4xbf16>, vector<2x4xf32> -> vector<2x4xf32>
    %126 = vector.broadcast %1 : vector<1x4xf32> to vector<2x4xf32>
    %127 = arith.addf %125, %126 : vector<2x4xf32>
    %cst_87 = arith.constant 0.000000e+00 : f32
    %128 = vector.broadcast %cst_87 : f32 to vector<2x4xf32>
    %129 = arith.maximumf %127, %128 : vector<2x4xf32>
    %130 = arith.truncf %129 : vector<2x4xf32> to vector<2x4xbf16>
    %c10_88 = arith.constant 10 : index
    %c0_89 = arith.constant 0 : index
    %c0_90 = arith.constant 0 : index
    %131 = vector.load %arg4[%c10_88, %c0_89, %c0_90] : memref<36x4x128xbf16, #tpu.memory_space<vmem>>, vector<1x4x128xbf16>
    %132 = vector.shape_cast %131 : vector<1x4x128xbf16> to vector<4x128xbf16>
    %cst_91 = arith.constant dense<0.000000e+00> : vector<2x128xf32>
    %133 = tpu.matmul %130, %132, %cst_91 {dimension_numbers = #tpu.dot_dimension_numbers<[1], [0], [0], [1], [0, 0, 1, 1], [], []>} : vector<2x4xbf16>, vector<4x128xbf16>, vector<2x128xf32> -> vector<2x128xf32>
    %134 = arith.addf %122, %133 : vector<2x128xf32>
    %c11 = arith.constant 11 : index
    %c0_92 = arith.constant 0 : index
    %c0_93 = arith.constant 0 : index
    %135 = vector.load %arg1[%c11, %c0_92, %c0_93] : memref<36x2x9xbf16, #tpu.memory_space<vmem>>, vector<1x2x9xbf16>
    %136 = vector.shape_cast %135 : vector<1x2x9xbf16> to vector<2x9xbf16>
    %cst_94 = arith.constant dense<0.000000e+00> : vector<2x4xf32>
    %137 = tpu.matmul %136, %0, %cst_94 {dimension_numbers = #tpu.dot_dimension_numbers<[1], [0], [0], [1], [0, 0, 1, 1], [], []>} : vector<2x9xbf16>, vector<9x4xbf16>, vector<2x4xf32> -> vector<2x4xf32>
    %138 = vector.broadcast %1 : vector<1x4xf32> to vector<2x4xf32>
    %139 = arith.addf %137, %138 : vector<2x4xf32>
    %cst_95 = arith.constant 0.000000e+00 : f32
    %140 = vector.broadcast %cst_95 : f32 to vector<2x4xf32>
    %141 = arith.maximumf %139, %140 : vector<2x4xf32>
    %142 = arith.truncf %141 : vector<2x4xf32> to vector<2x4xbf16>
    %c11_96 = arith.constant 11 : index
    %c0_97 = arith.constant 0 : index
    %c0_98 = arith.constant 0 : index
    %143 = vector.load %arg4[%c11_96, %c0_97, %c0_98] : memref<36x4x128xbf16, #tpu.memory_space<vmem>>, vector<1x4x128xbf16>
    %144 = vector.shape_cast %143 : vector<1x4x128xbf16> to vector<4x128xbf16>
    %cst_99 = arith.constant dense<0.000000e+00> : vector<2x128xf32>
    %145 = tpu.matmul %142, %144, %cst_99 {dimension_numbers = #tpu.dot_dimension_numbers<[1], [0], [0], [1], [0, 0, 1, 1], [], []>} : vector<2x4xbf16>, vector<4x128xbf16>, vector<2x128xf32> -> vector<2x128xf32>
    %146 = arith.addf %134, %145 : vector<2x128xf32>
    %c12 = arith.constant 12 : index
    %c0_100 = arith.constant 0 : index
    %c0_101 = arith.constant 0 : index
    %147 = vector.load %arg1[%c12, %c0_100, %c0_101] : memref<36x2x9xbf16, #tpu.memory_space<vmem>>, vector<1x2x9xbf16>
    %148 = vector.shape_cast %147 : vector<1x2x9xbf16> to vector<2x9xbf16>
    %cst_102 = arith.constant dense<0.000000e+00> : vector<2x4xf32>
    %149 = tpu.matmul %148, %0, %cst_102 {dimension_numbers = #tpu.dot_dimension_numbers<[1], [0], [0], [1], [0, 0, 1, 1], [], []>} : vector<2x9xbf16>, vector<9x4xbf16>, vector<2x4xf32> -> vector<2x4xf32>
    %150 = vector.broadcast %1 : vector<1x4xf32> to vector<2x4xf32>
    %151 = arith.addf %149, %150 : vector<2x4xf32>
    %cst_103 = arith.constant 0.000000e+00 : f32
    %152 = vector.broadcast %cst_103 : f32 to vector<2x4xf32>
    %153 = arith.maximumf %151, %152 : vector<2x4xf32>
    %154 = arith.truncf %153 : vector<2x4xf32> to vector<2x4xbf16>
    %c12_104 = arith.constant 12 : index
    %c0_105 = arith.constant 0 : index
    %c0_106 = arith.constant 0 : index
    %155 = vector.load %arg4[%c12_104, %c0_105, %c0_106] : memref<36x4x128xbf16, #tpu.memory_space<vmem>>, vector<1x4x128xbf16>
    %156 = vector.shape_cast %155 : vector<1x4x128xbf16> to vector<4x128xbf16>
    %cst_107 = arith.constant dense<0.000000e+00> : vector<2x128xf32>
    %157 = tpu.matmul %154, %156, %cst_107 {dimension_numbers = #tpu.dot_dimension_numbers<[1], [0], [0], [1], [0, 0, 1, 1], [], []>} : vector<2x4xbf16>, vector<4x128xbf16>, vector<2x128xf32> -> vector<2x128xf32>
    %158 = arith.addf %146, %157 : vector<2x128xf32>
    %c13 = arith.constant 13 : index
    %c0_108 = arith.constant 0 : index
    %c0_109 = arith.constant 0 : index
    %159 = vector.load %arg1[%c13, %c0_108, %c0_109] : memref<36x2x9xbf16, #tpu.memory_space<vmem>>, vector<1x2x9xbf16>
    %160 = vector.shape_cast %159 : vector<1x2x9xbf16> to vector<2x9xbf16>
    %cst_110 = arith.constant dense<0.000000e+00> : vector<2x4xf32>
    %161 = tpu.matmul %160, %0, %cst_110 {dimension_numbers = #tpu.dot_dimension_numbers<[1], [0], [0], [1], [0, 0, 1, 1], [], []>} : vector<2x9xbf16>, vector<9x4xbf16>, vector<2x4xf32> -> vector<2x4xf32>
    %162 = vector.broadcast %1 : vector<1x4xf32> to vector<2x4xf32>
    %163 = arith.addf %161, %162 : vector<2x4xf32>
    %cst_111 = arith.constant 0.000000e+00 : f32
    %164 = vector.broadcast %cst_111 : f32 to vector<2x4xf32>
    %165 = arith.maximumf %163, %164 : vector<2x4xf32>
    %166 = arith.truncf %165 : vector<2x4xf32> to vector<2x4xbf16>
    %c13_112 = arith.constant 13 : index
    %c0_113 = arith.constant 0 : index
    %c0_114 = arith.constant 0 : index
    %167 = vector.load %arg4[%c13_112, %c0_113, %c0_114] : memref<36x4x128xbf16, #tpu.memory_space<vmem>>, vector<1x4x128xbf16>
    %168 = vector.shape_cast %167 : vector<1x4x128xbf16> to vector<4x128xbf16>
    %cst_115 = arith.constant dense<0.000000e+00> : vector<2x128xf32>
    %169 = tpu.matmul %166, %168, %cst_115 {dimension_numbers = #tpu.dot_dimension_numbers<[1], [0], [0], [1], [0, 0, 1, 1], [], []>} : vector<2x4xbf16>, vector<4x128xbf16>, vector<2x128xf32> -> vector<2x128xf32>
    %170 = arith.addf %158, %169 : vector<2x128xf32>
    %c14 = arith.constant 14 : index
    %c0_116 = arith.constant 0 : index
    %c0_117 = arith.constant 0 : index
    %171 = vector.load %arg1[%c14, %c0_116, %c0_117] : memref<36x2x9xbf16, #tpu.memory_space<vmem>>, vector<1x2x9xbf16>
    %172 = vector.shape_cast %171 : vector<1x2x9xbf16> to vector<2x9xbf16>
    %cst_118 = arith.constant dense<0.000000e+00> : vector<2x4xf32>
    %173 = tpu.matmul %172, %0, %cst_118 {dimension_numbers = #tpu.dot_dimension_numbers<[1], [0], [0], [1], [0, 0, 1, 1], [], []>} : vector<2x9xbf16>, vector<9x4xbf16>, vector<2x4xf32> -> vector<2x4xf32>
    %174 = vector.broadcast %1 : vector<1x4xf32> to vector<2x4xf32>
    %175 = arith.addf %173, %174 : vector<2x4xf32>
    %cst_119 = arith.constant 0.000000e+00 : f32
    %176 = vector.broadcast %cst_119 : f32 to vector<2x4xf32>
    %177 = arith.maximumf %175, %176 : vector<2x4xf32>
    %178 = arith.truncf %177 : vector<2x4xf32> to vector<2x4xbf16>
    %c14_120 = arith.constant 14 : index
    %c0_121 = arith.constant 0 : index
    %c0_122 = arith.constant 0 : index
    %179 = vector.load %arg4[%c14_120, %c0_121, %c0_122] : memref<36x4x128xbf16, #tpu.memory_space<vmem>>, vector<1x4x128xbf16>
    %180 = vector.shape_cast %179 : vector<1x4x128xbf16> to vector<4x128xbf16>
    %cst_123 = arith.constant dense<0.000000e+00> : vector<2x128xf32>
    %181 = tpu.matmul %178, %180, %cst_123 {dimension_numbers = #tpu.dot_dimension_numbers<[1], [0], [0], [1], [0, 0, 1, 1], [], []>} : vector<2x4xbf16>, vector<4x128xbf16>, vector<2x128xf32> -> vector<2x128xf32>
    %182 = arith.addf %170, %181 : vector<2x128xf32>
    %c15 = arith.constant 15 : index
    %c0_124 = arith.constant 0 : index
    %c0_125 = arith.constant 0 : index
    %183 = vector.load %arg1[%c15, %c0_124, %c0_125] : memref<36x2x9xbf16, #tpu.memory_space<vmem>>, vector<1x2x9xbf16>
    %184 = vector.shape_cast %183 : vector<1x2x9xbf16> to vector<2x9xbf16>
    %cst_126 = arith.constant dense<0.000000e+00> : vector<2x4xf32>
    %185 = tpu.matmul %184, %0, %cst_126 {dimension_numbers = #tpu.dot_dimension_numbers<[1], [0], [0], [1], [0, 0, 1, 1], [], []>} : vector<2x9xbf16>, vector<9x4xbf16>, vector<2x4xf32> -> vector<2x4xf32>
    %186 = vector.broadcast %1 : vector<1x4xf32> to vector<2x4xf32>
    %187 = arith.addf %185, %186 : vector<2x4xf32>
    %cst_127 = arith.constant 0.000000e+00 : f32
    %188 = vector.broadcast %cst_127 : f32 to vector<2x4xf32>
    %189 = arith.maximumf %187, %188 : vector<2x4xf32>
    %190 = arith.truncf %189 : vector<2x4xf32> to vector<2x4xbf16>
    %c15_128 = arith.constant 15 : index
    %c0_129 = arith.constant 0 : index
    %c0_130 = arith.constant 0 : index
    %191 = vector.load %arg4[%c15_128, %c0_129, %c0_130] : memref<36x4x128xbf16, #tpu.memory_space<vmem>>, vector<1x4x128xbf16>
    %192 = vector.shape_cast %191 : vector<1x4x128xbf16> to vector<4x128xbf16>
    %cst_131 = arith.constant dense<0.000000e+00> : vector<2x128xf32>
    %193 = tpu.matmul %190, %192, %cst_131 {dimension_numbers = #tpu.dot_dimension_numbers<[1], [0], [0], [1], [0, 0, 1, 1], [], []>} : vector<2x4xbf16>, vector<4x128xbf16>, vector<2x128xf32> -> vector<2x128xf32>
    %194 = arith.addf %182, %193 : vector<2x128xf32>
    %c16 = arith.constant 16 : index
    %c0_132 = arith.constant 0 : index
    %c0_133 = arith.constant 0 : index
    %195 = vector.load %arg1[%c16, %c0_132, %c0_133] : memref<36x2x9xbf16, #tpu.memory_space<vmem>>, vector<1x2x9xbf16>
    %196 = vector.shape_cast %195 : vector<1x2x9xbf16> to vector<2x9xbf16>
    %cst_134 = arith.constant dense<0.000000e+00> : vector<2x4xf32>
    %197 = tpu.matmul %196, %0, %cst_134 {dimension_numbers = #tpu.dot_dimension_numbers<[1], [0], [0], [1], [0, 0, 1, 1], [], []>} : vector<2x9xbf16>, vector<9x4xbf16>, vector<2x4xf32> -> vector<2x4xf32>
    %198 = vector.broadcast %1 : vector<1x4xf32> to vector<2x4xf32>
    %199 = arith.addf %197, %198 : vector<2x4xf32>
    %cst_135 = arith.constant 0.000000e+00 : f32
    %200 = vector.broadcast %cst_135 : f32 to vector<2x4xf32>
    %201 = arith.maximumf %199, %200 : vector<2x4xf32>
    %202 = arith.truncf %201 : vector<2x4xf32> to vector<2x4xbf16>
    %c16_136 = arith.constant 16 : index
    %c0_137 = arith.constant 0 : index
    %c0_138 = arith.constant 0 : index
    %203 = vector.load %arg4[%c16_136, %c0_137, %c0_138] : memref<36x4x128xbf16, #tpu.memory_space<vmem>>, vector<1x4x128xbf16>
    %204 = vector.shape_cast %203 : vector<1x4x128xbf16> to vector<4x128xbf16>
    %cst_139 = arith.constant dense<0.000000e+00> : vector<2x128xf32>
    %205 = tpu.matmul %202, %204, %cst_139 {dimension_numbers = #tpu.dot_dimension_numbers<[1], [0], [0], [1], [0, 0, 1, 1], [], []>} : vector<2x4xbf16>, vector<4x128xbf16>, vector<2x128xf32> -> vector<2x128xf32>
    %206 = arith.addf %194, %205 : vector<2x128xf32>
    %c17 = arith.constant 17 : index
    %c0_140 = arith.constant 0 : index
    %c0_141 = arith.constant 0 : index
    %207 = vector.load %arg1[%c17, %c0_140, %c0_141] : memref<36x2x9xbf16, #tpu.memory_space<vmem>>, vector<1x2x9xbf16>
    %208 = vector.shape_cast %207 : vector<1x2x9xbf16> to vector<2x9xbf16>
    %cst_142 = arith.constant dense<0.000000e+00> : vector<2x4xf32>
    %209 = tpu.matmul %208, %0, %cst_142 {dimension_numbers = #tpu.dot_dimension_numbers<[1], [0], [0], [1], [0, 0, 1, 1], [], []>} : vector<2x9xbf16>, vector<9x4xbf16>, vector<2x4xf32> -> vector<2x4xf32>
    %210 = vector.broadcast %1 : vector<1x4xf32> to vector<2x4xf32>
    %211 = arith.addf %209, %210 : vector<2x4xf32>
    %cst_143 = arith.constant 0.000000e+00 : f32
    %212 = vector.broadcast %cst_143 : f32 to vector<2x4xf32>
    %213 = arith.maximumf %211, %212 : vector<2x4xf32>
    %214 = arith.truncf %213 : vector<2x4xf32> to vector<2x4xbf16>
    %c17_144 = arith.constant 17 : index
    %c0_145 = arith.constant 0 : index
    %c0_146 = arith.constant 0 : index
    %215 = vector.load %arg4[%c17_144, %c0_145, %c0_146] : memref<36x4x128xbf16, #tpu.memory_space<vmem>>, vector<1x4x128xbf16>
    %216 = vector.shape_cast %215 : vector<1x4x128xbf16> to vector<4x128xbf16>
    %cst_147 = arith.constant dense<0.000000e+00> : vector<2x128xf32>
    %217 = tpu.matmul %214, %216, %cst_147 {dimension_numbers = #tpu.dot_dimension_numbers<[1], [0], [0], [1], [0, 0, 1, 1], [], []>} : vector<2x4xbf16>, vector<4x128xbf16>, vector<2x128xf32> -> vector<2x128xf32>
    %218 = arith.addf %206, %217 : vector<2x128xf32>
    %c18 = arith.constant 18 : index
    %c0_148 = arith.constant 0 : index
    %c0_149 = arith.constant 0 : index
    %219 = vector.load %arg1[%c18, %c0_148, %c0_149] : memref<36x2x9xbf16, #tpu.memory_space<vmem>>, vector<1x2x9xbf16>
    %220 = vector.shape_cast %219 : vector<1x2x9xbf16> to vector<2x9xbf16>
    %cst_150 = arith.constant dense<0.000000e+00> : vector<2x4xf32>
    %221 = tpu.matmul %220, %0, %cst_150 {dimension_numbers = #tpu.dot_dimension_numbers<[1], [0], [0], [1], [0, 0, 1, 1], [], []>} : vector<2x9xbf16>, vector<9x4xbf16>, vector<2x4xf32> -> vector<2x4xf32>
    %222 = vector.broadcast %1 : vector<1x4xf32> to vector<2x4xf32>
    %223 = arith.addf %221, %222 : vector<2x4xf32>
    %cst_151 = arith.constant 0.000000e+00 : f32
    %224 = vector.broadcast %cst_151 : f32 to vector<2x4xf32>
    %225 = arith.maximumf %223, %224 : vector<2x4xf32>
    %226 = arith.truncf %225 : vector<2x4xf32> to vector<2x4xbf16>
    %c18_152 = arith.constant 18 : index
    %c0_153 = arith.constant 0 : index
    %c0_154 = arith.constant 0 : index
    %227 = vector.load %arg4[%c18_152, %c0_153, %c0_154] : memref<36x4x128xbf16, #tpu.memory_space<vmem>>, vector<1x4x128xbf16>
    %228 = vector.shape_cast %227 : vector<1x4x128xbf16> to vector<4x128xbf16>
    %cst_155 = arith.constant dense<0.000000e+00> : vector<2x128xf32>
    %229 = tpu.matmul %226, %228, %cst_155 {dimension_numbers = #tpu.dot_dimension_numbers<[1], [0], [0], [1], [0, 0, 1, 1], [], []>} : vector<2x4xbf16>, vector<4x128xbf16>, vector<2x128xf32> -> vector<2x128xf32>
    %230 = arith.addf %218, %229 : vector<2x128xf32>
    %c19 = arith.constant 19 : index
    %c0_156 = arith.constant 0 : index
    %c0_157 = arith.constant 0 : index
    %231 = vector.load %arg1[%c19, %c0_156, %c0_157] : memref<36x2x9xbf16, #tpu.memory_space<vmem>>, vector<1x2x9xbf16>
    %232 = vector.shape_cast %231 : vector<1x2x9xbf16> to vector<2x9xbf16>
    %cst_158 = arith.constant dense<0.000000e+00> : vector<2x4xf32>
    %233 = tpu.matmul %232, %0, %cst_158 {dimension_numbers = #tpu.dot_dimension_numbers<[1], [0], [0], [1], [0, 0, 1, 1], [], []>} : vector<2x9xbf16>, vector<9x4xbf16>, vector<2x4xf32> -> vector<2x4xf32>
    %234 = vector.broadcast %1 : vector<1x4xf32> to vector<2x4xf32>
    %235 = arith.addf %233, %234 : vector<2x4xf32>
    %cst_159 = arith.constant 0.000000e+00 : f32
    %236 = vector.broadcast %cst_159 : f32 to vector<2x4xf32>
    %237 = arith.maximumf %235, %236 : vector<2x4xf32>
    %238 = arith.truncf %237 : vector<2x4xf32> to vector<2x4xbf16>
    %c19_160 = arith.constant 19 : index
    %c0_161 = arith.constant 0 : index
    %c0_162 = arith.constant 0 : index
    %239 = vector.load %arg4[%c19_160, %c0_161, %c0_162] : memref<36x4x128xbf16, #tpu.memory_space<vmem>>, vector<1x4x128xbf16>
    %240 = vector.shape_cast %239 : vector<1x4x128xbf16> to vector<4x128xbf16>
    %cst_163 = arith.constant dense<0.000000e+00> : vector<2x128xf32>
    %241 = tpu.matmul %238, %240, %cst_163 {dimension_numbers = #tpu.dot_dimension_numbers<[1], [0], [0], [1], [0, 0, 1, 1], [], []>} : vector<2x4xbf16>, vector<4x128xbf16>, vector<2x128xf32> -> vector<2x128xf32>
    %242 = arith.addf %230, %241 : vector<2x128xf32>
    %c20 = arith.constant 20 : index
    %c0_164 = arith.constant 0 : index
    %c0_165 = arith.constant 0 : index
    %243 = vector.load %arg1[%c20, %c0_164, %c0_165] : memref<36x2x9xbf16, #tpu.memory_space<vmem>>, vector<1x2x9xbf16>
    %244 = vector.shape_cast %243 : vector<1x2x9xbf16> to vector<2x9xbf16>
    %cst_166 = arith.constant dense<0.000000e+00> : vector<2x4xf32>
    %245 = tpu.matmul %244, %0, %cst_166 {dimension_numbers = #tpu.dot_dimension_numbers<[1], [0], [0], [1], [0, 0, 1, 1], [], []>} : vector<2x9xbf16>, vector<9x4xbf16>, vector<2x4xf32> -> vector<2x4xf32>
    %246 = vector.broadcast %1 : vector<1x4xf32> to vector<2x4xf32>
    %247 = arith.addf %245, %246 : vector<2x4xf32>
    %cst_167 = arith.constant 0.000000e+00 : f32
    %248 = vector.broadcast %cst_167 : f32 to vector<2x4xf32>
    %249 = arith.maximumf %247, %248 : vector<2x4xf32>
    %250 = arith.truncf %249 : vector<2x4xf32> to vector<2x4xbf16>
    %c20_168 = arith.constant 20 : index
    %c0_169 = arith.constant 0 : index
    %c0_170 = arith.constant 0 : index
    %251 = vector.load %arg4[%c20_168, %c0_169, %c0_170] : memref<36x4x128xbf16, #tpu.memory_space<vmem>>, vector<1x4x128xbf16>
    %252 = vector.shape_cast %251 : vector<1x4x128xbf16> to vector<4x128xbf16>
    %cst_171 = arith.constant dense<0.000000e+00> : vector<2x128xf32>
    %253 = tpu.matmul %250, %252, %cst_171 {dimension_numbers = #tpu.dot_dimension_numbers<[1], [0], [0], [1], [0, 0, 1, 1], [], []>} : vector<2x4xbf16>, vector<4x128xbf16>, vector<2x128xf32> -> vector<2x128xf32>
    %254 = arith.addf %242, %253 : vector<2x128xf32>
    %c21 = arith.constant 21 : index
    %c0_172 = arith.constant 0 : index
    %c0_173 = arith.constant 0 : index
    %255 = vector.load %arg1[%c21, %c0_172, %c0_173] : memref<36x2x9xbf16, #tpu.memory_space<vmem>>, vector<1x2x9xbf16>
    %256 = vector.shape_cast %255 : vector<1x2x9xbf16> to vector<2x9xbf16>
    %cst_174 = arith.constant dense<0.000000e+00> : vector<2x4xf32>
    %257 = tpu.matmul %256, %0, %cst_174 {dimension_numbers = #tpu.dot_dimension_numbers<[1], [0], [0], [1], [0, 0, 1, 1], [], []>} : vector<2x9xbf16>, vector<9x4xbf16>, vector<2x4xf32> -> vector<2x4xf32>
    %258 = vector.broadcast %1 : vector<1x4xf32> to vector<2x4xf32>
    %259 = arith.addf %257, %258 : vector<2x4xf32>
    %cst_175 = arith.constant 0.000000e+00 : f32
    %260 = vector.broadcast %cst_175 : f32 to vector<2x4xf32>
    %261 = arith.maximumf %259, %260 : vector<2x4xf32>
    %262 = arith.truncf %261 : vector<2x4xf32> to vector<2x4xbf16>
    %c21_176 = arith.constant 21 : index
    %c0_177 = arith.constant 0 : index
    %c0_178 = arith.constant 0 : index
    %263 = vector.load %arg4[%c21_176, %c0_177, %c0_178] : memref<36x4x128xbf16, #tpu.memory_space<vmem>>, vector<1x4x128xbf16>
    %264 = vector.shape_cast %263 : vector<1x4x128xbf16> to vector<4x128xbf16>
    %cst_179 = arith.constant dense<0.000000e+00> : vector<2x128xf32>
    %265 = tpu.matmul %262, %264, %cst_179 {dimension_numbers = #tpu.dot_dimension_numbers<[1], [0], [0], [1], [0, 0, 1, 1], [], []>} : vector<2x4xbf16>, vector<4x128xbf16>, vector<2x128xf32> -> vector<2x128xf32>
    %266 = arith.addf %254, %265 : vector<2x128xf32>
    %c22 = arith.constant 22 : index
    %c0_180 = arith.constant 0 : index
    %c0_181 = arith.constant 0 : index
    %267 = vector.load %arg1[%c22, %c0_180, %c0_181] : memref<36x2x9xbf16, #tpu.memory_space<vmem>>, vector<1x2x9xbf16>
    %268 = vector.shape_cast %267 : vector<1x2x9xbf16> to vector<2x9xbf16>
    %cst_182 = arith.constant dense<0.000000e+00> : vector<2x4xf32>
    %269 = tpu.matmul %268, %0, %cst_182 {dimension_numbers = #tpu.dot_dimension_numbers<[1], [0], [0], [1], [0, 0, 1, 1], [], []>} : vector<2x9xbf16>, vector<9x4xbf16>, vector<2x4xf32> -> vector<2x4xf32>
    %270 = vector.broadcast %1 : vector<1x4xf32> to vector<2x4xf32>
    %271 = arith.addf %269, %270 : vector<2x4xf32>
    %cst_183 = arith.constant 0.000000e+00 : f32
    %272 = vector.broadcast %cst_183 : f32 to vector<2x4xf32>
    %273 = arith.maximumf %271, %272 : vector<2x4xf32>
    %274 = arith.truncf %273 : vector<2x4xf32> to vector<2x4xbf16>
    %c22_184 = arith.constant 22 : index
    %c0_185 = arith.constant 0 : index
    %c0_186 = arith.constant 0 : index
    %275 = vector.load %arg4[%c22_184, %c0_185, %c0_186] : memref<36x4x128xbf16, #tpu.memory_space<vmem>>, vector<1x4x128xbf16>
    %276 = vector.shape_cast %275 : vector<1x4x128xbf16> to vector<4x128xbf16>
    %cst_187 = arith.constant dense<0.000000e+00> : vector<2x128xf32>
    %277 = tpu.matmul %274, %276, %cst_187 {dimension_numbers = #tpu.dot_dimension_numbers<[1], [0], [0], [1], [0, 0, 1, 1], [], []>} : vector<2x4xbf16>, vector<4x128xbf16>, vector<2x128xf32> -> vector<2x128xf32>
    %278 = arith.addf %266, %277 : vector<2x128xf32>
    %c23 = arith.constant 23 : index
    %c0_188 = arith.constant 0 : index
    %c0_189 = arith.constant 0 : index
    %279 = vector.load %arg1[%c23, %c0_188, %c0_189] : memref<36x2x9xbf16, #tpu.memory_space<vmem>>, vector<1x2x9xbf16>
    %280 = vector.shape_cast %279 : vector<1x2x9xbf16> to vector<2x9xbf16>
    %cst_190 = arith.constant dense<0.000000e+00> : vector<2x4xf32>
    %281 = tpu.matmul %280, %0, %cst_190 {dimension_numbers = #tpu.dot_dimension_numbers<[1], [0], [0], [1], [0, 0, 1, 1], [], []>} : vector<2x9xbf16>, vector<9x4xbf16>, vector<2x4xf32> -> vector<2x4xf32>
    %282 = vector.broadcast %1 : vector<1x4xf32> to vector<2x4xf32>
    %283 = arith.addf %281, %282 : vector<2x4xf32>
    %cst_191 = arith.constant 0.000000e+00 : f32
    %284 = vector.broadcast %cst_191 : f32 to vector<2x4xf32>
    %285 = arith.maximumf %283, %284 : vector<2x4xf32>
    %286 = arith.truncf %285 : vector<2x4xf32> to vector<2x4xbf16>
    %c23_192 = arith.constant 23 : index
    %c0_193 = arith.constant 0 : index
    %c0_194 = arith.constant 0 : index
    %287 = vector.load %arg4[%c23_192, %c0_193, %c0_194] : memref<36x4x128xbf16, #tpu.memory_space<vmem>>, vector<1x4x128xbf16>
    %288 = vector.shape_cast %287 : vector<1x4x128xbf16> to vector<4x128xbf16>
    %cst_195 = arith.constant dense<0.000000e+00> : vector<2x128xf32>
    %289 = tpu.matmul %286, %288, %cst_195 {dimension_numbers = #tpu.dot_dimension_numbers<[1], [0], [0], [1], [0, 0, 1, 1], [], []>} : vector<2x4xbf16>, vector<4x128xbf16>, vector<2x128xf32> -> vector<2x128xf32>
    %290 = arith.addf %278, %289 : vector<2x128xf32>
    %c24 = arith.constant 24 : index
    %c0_196 = arith.constant 0 : index
    %c0_197 = arith.constant 0 : index
    %291 = vector.load %arg1[%c24, %c0_196, %c0_197] : memref<36x2x9xbf16, #tpu.memory_space<vmem>>, vector<1x2x9xbf16>
    %292 = vector.shape_cast %291 : vector<1x2x9xbf16> to vector<2x9xbf16>
    %cst_198 = arith.constant dense<0.000000e+00> : vector<2x4xf32>
    %293 = tpu.matmul %292, %0, %cst_198 {dimension_numbers = #tpu.dot_dimension_numbers<[1], [0], [0], [1], [0, 0, 1, 1], [], []>} : vector<2x9xbf16>, vector<9x4xbf16>, vector<2x4xf32> -> vector<2x4xf32>
    %294 = vector.broadcast %1 : vector<1x4xf32> to vector<2x4xf32>
    %295 = arith.addf %293, %294 : vector<2x4xf32>
    %cst_199 = arith.constant 0.000000e+00 : f32
    %296 = vector.broadcast %cst_199 : f32 to vector<2x4xf32>
    %297 = arith.maximumf %295, %296 : vector<2x4xf32>
    %298 = arith.truncf %297 : vector<2x4xf32> to vector<2x4xbf16>
    %c24_200 = arith.constant 24 : index
    %c0_201 = arith.constant 0 : index
    %c0_202 = arith.constant 0 : index
    %299 = vector.load %arg4[%c24_200, %c0_201, %c0_202] : memref<36x4x128xbf16, #tpu.memory_space<vmem>>, vector<1x4x128xbf16>
    %300 = vector.shape_cast %299 : vector<1x4x128xbf16> to vector<4x128xbf16>
    %cst_203 = arith.constant dense<0.000000e+00> : vector<2x128xf32>
    %301 = tpu.matmul %298, %300, %cst_203 {dimension_numbers = #tpu.dot_dimension_numbers<[1], [0], [0], [1], [0, 0, 1, 1], [], []>} : vector<2x4xbf16>, vector<4x128xbf16>, vector<2x128xf32> -> vector<2x128xf32>
    %302 = arith.addf %290, %301 : vector<2x128xf32>
    %c25 = arith.constant 25 : index
    %c0_204 = arith.constant 0 : index
    %c0_205 = arith.constant 0 : index
    %303 = vector.load %arg1[%c25, %c0_204, %c0_205] : memref<36x2x9xbf16, #tpu.memory_space<vmem>>, vector<1x2x9xbf16>
    %304 = vector.shape_cast %303 : vector<1x2x9xbf16> to vector<2x9xbf16>
    %cst_206 = arith.constant dense<0.000000e+00> : vector<2x4xf32>
    %305 = tpu.matmul %304, %0, %cst_206 {dimension_numbers = #tpu.dot_dimension_numbers<[1], [0], [0], [1], [0, 0, 1, 1], [], []>} : vector<2x9xbf16>, vector<9x4xbf16>, vector<2x4xf32> -> vector<2x4xf32>
    %306 = vector.broadcast %1 : vector<1x4xf32> to vector<2x4xf32>
    %307 = arith.addf %305, %306 : vector<2x4xf32>
    %cst_207 = arith.constant 0.000000e+00 : f32
    %308 = vector.broadcast %cst_207 : f32 to vector<2x4xf32>
    %309 = arith.maximumf %307, %308 : vector<2x4xf32>
    %310 = arith.truncf %309 : vector<2x4xf32> to vector<2x4xbf16>
    %c25_208 = arith.constant 25 : index
    %c0_209 = arith.constant 0 : index
    %c0_210 = arith.constant 0 : index
    %311 = vector.load %arg4[%c25_208, %c0_209, %c0_210] : memref<36x4x128xbf16, #tpu.memory_space<vmem>>, vector<1x4x128xbf16>
    %312 = vector.shape_cast %311 : vector<1x4x128xbf16> to vector<4x128xbf16>
    %cst_211 = arith.constant dense<0.000000e+00> : vector<2x128xf32>
    %313 = tpu.matmul %310, %312, %cst_211 {dimension_numbers = #tpu.dot_dimension_numbers<[1], [0], [0], [1], [0, 0, 1, 1], [], []>} : vector<2x4xbf16>, vector<4x128xbf16>, vector<2x128xf32> -> vector<2x128xf32>
    %314 = arith.addf %302, %313 : vector<2x128xf32>
    %c26 = arith.constant 26 : index
    %c0_212 = arith.constant 0 : index
    %c0_213 = arith.constant 0 : index
    %315 = vector.load %arg1[%c26, %c0_212, %c0_213] : memref<36x2x9xbf16, #tpu.memory_space<vmem>>, vector<1x2x9xbf16>
    %316 = vector.shape_cast %315 : vector<1x2x9xbf16> to vector<2x9xbf16>
    %cst_214 = arith.constant dense<0.000000e+00> : vector<2x4xf32>
    %317 = tpu.matmul %316, %0, %cst_214 {dimension_numbers = #tpu.dot_dimension_numbers<[1], [0], [0], [1], [0, 0, 1, 1], [], []>} : vector<2x9xbf16>, vector<9x4xbf16>, vector<2x4xf32> -> vector<2x4xf32>
    %318 = vector.broadcast %1 : vector<1x4xf32> to vector<2x4xf32>
    %319 = arith.addf %317, %318 : vector<2x4xf32>
    %cst_215 = arith.constant 0.000000e+00 : f32
    %320 = vector.broadcast %cst_215 : f32 to vector<2x4xf32>
    %321 = arith.maximumf %319, %320 : vector<2x4xf32>
    %322 = arith.truncf %321 : vector<2x4xf32> to vector<2x4xbf16>
    %c26_216 = arith.constant 26 : index
    %c0_217 = arith.constant 0 : index
    %c0_218 = arith.constant 0 : index
    %323 = vector.load %arg4[%c26_216, %c0_217, %c0_218] : memref<36x4x128xbf16, #tpu.memory_space<vmem>>, vector<1x4x128xbf16>
    %324 = vector.shape_cast %323 : vector<1x4x128xbf16> to vector<4x128xbf16>
    %cst_219 = arith.constant dense<0.000000e+00> : vector<2x128xf32>
    %325 = tpu.matmul %322, %324, %cst_219 {dimension_numbers = #tpu.dot_dimension_numbers<[1], [0], [0], [1], [0, 0, 1, 1], [], []>} : vector<2x4xbf16>, vector<4x128xbf16>, vector<2x128xf32> -> vector<2x128xf32>
    %326 = arith.addf %314, %325 : vector<2x128xf32>
    %c27 = arith.constant 27 : index
    %c0_220 = arith.constant 0 : index
    %c0_221 = arith.constant 0 : index
    %327 = vector.load %arg1[%c27, %c0_220, %c0_221] : memref<36x2x9xbf16, #tpu.memory_space<vmem>>, vector<1x2x9xbf16>
    %328 = vector.shape_cast %327 : vector<1x2x9xbf16> to vector<2x9xbf16>
    %cst_222 = arith.constant dense<0.000000e+00> : vector<2x4xf32>
    %329 = tpu.matmul %328, %0, %cst_222 {dimension_numbers = #tpu.dot_dimension_numbers<[1], [0], [0], [1], [0, 0, 1, 1], [], []>} : vector<2x9xbf16>, vector<9x4xbf16>, vector<2x4xf32> -> vector<2x4xf32>
    %330 = vector.broadcast %1 : vector<1x4xf32> to vector<2x4xf32>
    %331 = arith.addf %329, %330 : vector<2x4xf32>
    %cst_223 = arith.constant 0.000000e+00 : f32
    %332 = vector.broadcast %cst_223 : f32 to vector<2x4xf32>
    %333 = arith.maximumf %331, %332 : vector<2x4xf32>
    %334 = arith.truncf %333 : vector<2x4xf32> to vector<2x4xbf16>
    %c27_224 = arith.constant 27 : index
    %c0_225 = arith.constant 0 : index
    %c0_226 = arith.constant 0 : index
    %335 = vector.load %arg4[%c27_224, %c0_225, %c0_226] : memref<36x4x128xbf16, #tpu.memory_space<vmem>>, vector<1x4x128xbf16>
    %336 = vector.shape_cast %335 : vector<1x4x128xbf16> to vector<4x128xbf16>
    %cst_227 = arith.constant dense<0.000000e+00> : vector<2x128xf32>
    %337 = tpu.matmul %334, %336, %cst_227 {dimension_numbers = #tpu.dot_dimension_numbers<[1], [0], [0], [1], [0, 0, 1, 1], [], []>} : vector<2x4xbf16>, vector<4x128xbf16>, vector<2x128xf32> -> vector<2x128xf32>
    %338 = arith.addf %326, %337 : vector<2x128xf32>
    %c28 = arith.constant 28 : index
    %c0_228 = arith.constant 0 : index
    %c0_229 = arith.constant 0 : index
    %339 = vector.load %arg1[%c28, %c0_228, %c0_229] : memref<36x2x9xbf16, #tpu.memory_space<vmem>>, vector<1x2x9xbf16>
    %340 = vector.shape_cast %339 : vector<1x2x9xbf16> to vector<2x9xbf16>
    %cst_230 = arith.constant dense<0.000000e+00> : vector<2x4xf32>
    %341 = tpu.matmul %340, %0, %cst_230 {dimension_numbers = #tpu.dot_dimension_numbers<[1], [0], [0], [1], [0, 0, 1, 1], [], []>} : vector<2x9xbf16>, vector<9x4xbf16>, vector<2x4xf32> -> vector<2x4xf32>
    %342 = vector.broadcast %1 : vector<1x4xf32> to vector<2x4xf32>
    %343 = arith.addf %341, %342 : vector<2x4xf32>
    %cst_231 = arith.constant 0.000000e+00 : f32
    %344 = vector.broadcast %cst_231 : f32 to vector<2x4xf32>
    %345 = arith.maximumf %343, %344 : vector<2x4xf32>
    %346 = arith.truncf %345 : vector<2x4xf32> to vector<2x4xbf16>
    %c28_232 = arith.constant 28 : index
    %c0_233 = arith.constant 0 : index
    %c0_234 = arith.constant 0 : index
    %347 = vector.load %arg4[%c28_232, %c0_233, %c0_234] : memref<36x4x128xbf16, #tpu.memory_space<vmem>>, vector<1x4x128xbf16>
    %348 = vector.shape_cast %347 : vector<1x4x128xbf16> to vector<4x128xbf16>
    %cst_235 = arith.constant dense<0.000000e+00> : vector<2x128xf32>
    %349 = tpu.matmul %346, %348, %cst_235 {dimension_numbers = #tpu.dot_dimension_numbers<[1], [0], [0], [1], [0, 0, 1, 1], [], []>} : vector<2x4xbf16>, vector<4x128xbf16>, vector<2x128xf32> -> vector<2x128xf32>
    %350 = arith.addf %338, %349 : vector<2x128xf32>
    %c29 = arith.constant 29 : index
    %c0_236 = arith.constant 0 : index
    %c0_237 = arith.constant 0 : index
    %351 = vector.load %arg1[%c29, %c0_236, %c0_237] : memref<36x2x9xbf16, #tpu.memory_space<vmem>>, vector<1x2x9xbf16>
    %352 = vector.shape_cast %351 : vector<1x2x9xbf16> to vector<2x9xbf16>
    %cst_238 = arith.constant dense<0.000000e+00> : vector<2x4xf32>
    %353 = tpu.matmul %352, %0, %cst_238 {dimension_numbers = #tpu.dot_dimension_numbers<[1], [0], [0], [1], [0, 0, 1, 1], [], []>} : vector<2x9xbf16>, vector<9x4xbf16>, vector<2x4xf32> -> vector<2x4xf32>
    %354 = vector.broadcast %1 : vector<1x4xf32> to vector<2x4xf32>
    %355 = arith.addf %353, %354 : vector<2x4xf32>
    %cst_239 = arith.constant 0.000000e+00 : f32
    %356 = vector.broadcast %cst_239 : f32 to vector<2x4xf32>
    %357 = arith.maximumf %355, %356 : vector<2x4xf32>
    %358 = arith.truncf %357 : vector<2x4xf32> to vector<2x4xbf16>
    %c29_240 = arith.constant 29 : index
    %c0_241 = arith.constant 0 : index
    %c0_242 = arith.constant 0 : index
    %359 = vector.load %arg4[%c29_240, %c0_241, %c0_242] : memref<36x4x128xbf16, #tpu.memory_space<vmem>>, vector<1x4x128xbf16>
    %360 = vector.shape_cast %359 : vector<1x4x128xbf16> to vector<4x128xbf16>
    %cst_243 = arith.constant dense<0.000000e+00> : vector<2x128xf32>
    %361 = tpu.matmul %358, %360, %cst_243 {dimension_numbers = #tpu.dot_dimension_numbers<[1], [0], [0], [1], [0, 0, 1, 1], [], []>} : vector<2x4xbf16>, vector<4x128xbf16>, vector<2x128xf32> -> vector<2x128xf32>
    %362 = arith.addf %350, %361 : vector<2x128xf32>
    %c30 = arith.constant 30 : index
    %c0_244 = arith.constant 0 : index
    %c0_245 = arith.constant 0 : index
    %363 = vector.load %arg1[%c30, %c0_244, %c0_245] : memref<36x2x9xbf16, #tpu.memory_space<vmem>>, vector<1x2x9xbf16>
    %364 = vector.shape_cast %363 : vector<1x2x9xbf16> to vector<2x9xbf16>
    %cst_246 = arith.constant dense<0.000000e+00> : vector<2x4xf32>
    %365 = tpu.matmul %364, %0, %cst_246 {dimension_numbers = #tpu.dot_dimension_numbers<[1], [0], [0], [1], [0, 0, 1, 1], [], []>} : vector<2x9xbf16>, vector<9x4xbf16>, vector<2x4xf32> -> vector<2x4xf32>
    %366 = vector.broadcast %1 : vector<1x4xf32> to vector<2x4xf32>
    %367 = arith.addf %365, %366 : vector<2x4xf32>
    %cst_247 = arith.constant 0.000000e+00 : f32
    %368 = vector.broadcast %cst_247 : f32 to vector<2x4xf32>
    %369 = arith.maximumf %367, %368 : vector<2x4xf32>
    %370 = arith.truncf %369 : vector<2x4xf32> to vector<2x4xbf16>
    %c30_248 = arith.constant 30 : index
    %c0_249 = arith.constant 0 : index
    %c0_250 = arith.constant 0 : index
    %371 = vector.load %arg4[%c30_248, %c0_249, %c0_250] : memref<36x4x128xbf16, #tpu.memory_space<vmem>>, vector<1x4x128xbf16>
    %372 = vector.shape_cast %371 : vector<1x4x128xbf16> to vector<4x128xbf16>
    %cst_251 = arith.constant dense<0.000000e+00> : vector<2x128xf32>
    %373 = tpu.matmul %370, %372, %cst_251 {dimension_numbers = #tpu.dot_dimension_numbers<[1], [0], [0], [1], [0, 0, 1, 1], [], []>} : vector<2x4xbf16>, vector<4x128xbf16>, vector<2x128xf32> -> vector<2x128xf32>
    %374 = arith.addf %362, %373 : vector<2x128xf32>
    %c31 = arith.constant 31 : index
    %c0_252 = arith.constant 0 : index
    %c0_253 = arith.constant 0 : index
    %375 = vector.load %arg1[%c31, %c0_252, %c0_253] : memref<36x2x9xbf16, #tpu.memory_space<vmem>>, vector<1x2x9xbf16>
    %376 = vector.shape_cast %375 : vector<1x2x9xbf16> to vector<2x9xbf16>
    %cst_254 = arith.constant dense<0.000000e+00> : vector<2x4xf32>
    %377 = tpu.matmul %376, %0, %cst_254 {dimension_numbers = #tpu.dot_dimension_numbers<[1], [0], [0], [1], [0, 0, 1, 1], [], []>} : vector<2x9xbf16>, vector<9x4xbf16>, vector<2x4xf32> -> vector<2x4xf32>
    %378 = vector.broadcast %1 : vector<1x4xf32> to vector<2x4xf32>
    %379 = arith.addf %377, %378 : vector<2x4xf32>
    %cst_255 = arith.constant 0.000000e+00 : f32
    %380 = vector.broadcast %cst_255 : f32 to vector<2x4xf32>
    %381 = arith.maximumf %379, %380 : vector<2x4xf32>
    %382 = arith.truncf %381 : vector<2x4xf32> to vector<2x4xbf16>
    %c31_256 = arith.constant 31 : index
    %c0_257 = arith.constant 0 : index
    %c0_258 = arith.constant 0 : index
    %383 = vector.load %arg4[%c31_256, %c0_257, %c0_258] : memref<36x4x128xbf16, #tpu.memory_space<vmem>>, vector<1x4x128xbf16>
    %384 = vector.shape_cast %383 : vector<1x4x128xbf16> to vector<4x128xbf16>
    %cst_259 = arith.constant dense<0.000000e+00> : vector<2x128xf32>
    %385 = tpu.matmul %382, %384, %cst_259 {dimension_numbers = #tpu.dot_dimension_numbers<[1], [0], [0], [1], [0, 0, 1, 1], [], []>} : vector<2x4xbf16>, vector<4x128xbf16>, vector<2x128xf32> -> vector<2x128xf32>
    %386 = arith.addf %374, %385 : vector<2x128xf32>
    %c32 = arith.constant 32 : index
    %c0_260 = arith.constant 0 : index
    %c0_261 = arith.constant 0 : index
    %387 = vector.load %arg1[%c32, %c0_260, %c0_261] : memref<36x2x9xbf16, #tpu.memory_space<vmem>>, vector<1x2x9xbf16>
    %388 = vector.shape_cast %387 : vector<1x2x9xbf16> to vector<2x9xbf16>
    %cst_262 = arith.constant dense<0.000000e+00> : vector<2x4xf32>
    %389 = tpu.matmul %388, %0, %cst_262 {dimension_numbers = #tpu.dot_dimension_numbers<[1], [0], [0], [1], [0, 0, 1, 1], [], []>} : vector<2x9xbf16>, vector<9x4xbf16>, vector<2x4xf32> -> vector<2x4xf32>
    %390 = vector.broadcast %1 : vector<1x4xf32> to vector<2x4xf32>
    %391 = arith.addf %389, %390 : vector<2x4xf32>
    %cst_263 = arith.constant 0.000000e+00 : f32
    %392 = vector.broadcast %cst_263 : f32 to vector<2x4xf32>
    %393 = arith.maximumf %391, %392 : vector<2x4xf32>
    %394 = arith.truncf %393 : vector<2x4xf32> to vector<2x4xbf16>
    %c32_264 = arith.constant 32 : index
    %c0_265 = arith.constant 0 : index
    %c0_266 = arith.constant 0 : index
    %395 = vector.load %arg4[%c32_264, %c0_265, %c0_266] : memref<36x4x128xbf16, #tpu.memory_space<vmem>>, vector<1x4x128xbf16>
    %396 = vector.shape_cast %395 : vector<1x4x128xbf16> to vector<4x128xbf16>
    %cst_267 = arith.constant dense<0.000000e+00> : vector<2x128xf32>
    %397 = tpu.matmul %394, %396, %cst_267 {dimension_numbers = #tpu.dot_dimension_numbers<[1], [0], [0], [1], [0, 0, 1, 1], [], []>} : vector<2x4xbf16>, vector<4x128xbf16>, vector<2x128xf32> -> vector<2x128xf32>
    %398 = arith.addf %386, %397 : vector<2x128xf32>
    %c33 = arith.constant 33 : index
    %c0_268 = arith.constant 0 : index
    %c0_269 = arith.constant 0 : index
    %399 = vector.load %arg1[%c33, %c0_268, %c0_269] : memref<36x2x9xbf16, #tpu.memory_space<vmem>>, vector<1x2x9xbf16>
    %400 = vector.shape_cast %399 : vector<1x2x9xbf16> to vector<2x9xbf16>
    %cst_270 = arith.constant dense<0.000000e+00> : vector<2x4xf32>
    %401 = tpu.matmul %400, %0, %cst_270 {dimension_numbers = #tpu.dot_dimension_numbers<[1], [0], [0], [1], [0, 0, 1, 1], [], []>} : vector<2x9xbf16>, vector<9x4xbf16>, vector<2x4xf32> -> vector<2x4xf32>
    %402 = vector.broadcast %1 : vector<1x4xf32> to vector<2x4xf32>
    %403 = arith.addf %401, %402 : vector<2x4xf32>
    %cst_271 = arith.constant 0.000000e+00 : f32
    %404 = vector.broadcast %cst_271 : f32 to vector<2x4xf32>
    %405 = arith.maximumf %403, %404 : vector<2x4xf32>
    %406 = arith.truncf %405 : vector<2x4xf32> to vector<2x4xbf16>
    %c33_272 = arith.constant 33 : index
    %c0_273 = arith.constant 0 : index
    %c0_274 = arith.constant 0 : index
    %407 = vector.load %arg4[%c33_272, %c0_273, %c0_274] : memref<36x4x128xbf16, #tpu.memory_space<vmem>>, vector<1x4x128xbf16>
    %408 = vector.shape_cast %407 : vector<1x4x128xbf16> to vector<4x128xbf16>
    %cst_275 = arith.constant dense<0.000000e+00> : vector<2x128xf32>
    %409 = tpu.matmul %406, %408, %cst_275 {dimension_numbers = #tpu.dot_dimension_numbers<[1], [0], [0], [1], [0, 0, 1, 1], [], []>} : vector<2x4xbf16>, vector<4x128xbf16>, vector<2x128xf32> -> vector<2x128xf32>
    %410 = arith.addf %398, %409 : vector<2x128xf32>
    %c34 = arith.constant 34 : index
    %c0_276 = arith.constant 0 : index
    %c0_277 = arith.constant 0 : index
    %411 = vector.load %arg1[%c34, %c0_276, %c0_277] : memref<36x2x9xbf16, #tpu.memory_space<vmem>>, vector<1x2x9xbf16>
    %412 = vector.shape_cast %411 : vector<1x2x9xbf16> to vector<2x9xbf16>
    %cst_278 = arith.constant dense<0.000000e+00> : vector<2x4xf32>
    %413 = tpu.matmul %412, %0, %cst_278 {dimension_numbers = #tpu.dot_dimension_numbers<[1], [0], [0], [1], [0, 0, 1, 1], [], []>} : vector<2x9xbf16>, vector<9x4xbf16>, vector<2x4xf32> -> vector<2x4xf32>
    %414 = vector.broadcast %1 : vector<1x4xf32> to vector<2x4xf32>
    %415 = arith.addf %413, %414 : vector<2x4xf32>
    %cst_279 = arith.constant 0.000000e+00 : f32
    %416 = vector.broadcast %cst_279 : f32 to vector<2x4xf32>
    %417 = arith.maximumf %415, %416 : vector<2x4xf32>
    %418 = arith.truncf %417 : vector<2x4xf32> to vector<2x4xbf16>
    %c34_280 = arith.constant 34 : index
    %c0_281 = arith.constant 0 : index
    %c0_282 = arith.constant 0 : index
    %419 = vector.load %arg4[%c34_280, %c0_281, %c0_282] : memref<36x4x128xbf16, #tpu.memory_space<vmem>>, vector<1x4x128xbf16>
    %420 = vector.shape_cast %419 : vector<1x4x128xbf16> to vector<4x128xbf16>
    %cst_283 = arith.constant dense<0.000000e+00> : vector<2x128xf32>
    %421 = tpu.matmul %418, %420, %cst_283 {dimension_numbers = #tpu.dot_dimension_numbers<[1], [0], [0], [1], [0, 0, 1, 1], [], []>} : vector<2x4xbf16>, vector<4x128xbf16>, vector<2x128xf32> -> vector<2x128xf32>
    %422 = arith.addf %410, %421 : vector<2x128xf32>
    %c35 = arith.constant 35 : index
    %c0_284 = arith.constant 0 : index
    %c0_285 = arith.constant 0 : index
    %423 = vector.load %arg1[%c35, %c0_284, %c0_285] : memref<36x2x9xbf16, #tpu.memory_space<vmem>>, vector<1x2x9xbf16>
    %424 = vector.shape_cast %423 : vector<1x2x9xbf16> to vector<2x9xbf16>
    %cst_286 = arith.constant dense<0.000000e+00> : vector<2x4xf32>
    %425 = tpu.matmul %424, %0, %cst_286 {dimension_numbers = #tpu.dot_dimension_numbers<[1], [0], [0], [1], [0, 0, 1, 1], [], []>} : vector<2x9xbf16>, vector<9x4xbf16>, vector<2x4xf32> -> vector<2x4xf32>
    %426 = vector.broadcast %1 : vector<1x4xf32> to vector<2x4xf32>
    %427 = arith.addf %425, %426 : vector<2x4xf32>
    %cst_287 = arith.constant 0.000000e+00 : f32
    %428 = vector.broadcast %cst_287 : f32 to vector<2x4xf32>
    %429 = arith.maximumf %427, %428 : vector<2x4xf32>
    %430 = arith.truncf %429 : vector<2x4xf32> to vector<2x4xbf16>
    %c35_288 = arith.constant 35 : index
    %c0_289 = arith.constant 0 : index
    %c0_290 = arith.constant 0 : index
    %431 = vector.load %arg4[%c35_288, %c0_289, %c0_290] : memref<36x4x128xbf16, #tpu.memory_space<vmem>>, vector<1x4x128xbf16>
    %432 = vector.shape_cast %431 : vector<1x4x128xbf16> to vector<4x128xbf16>
    %cst_291 = arith.constant dense<0.000000e+00> : vector<2x128xf32>
    %433 = tpu.matmul %430, %432, %cst_291 {dimension_numbers = #tpu.dot_dimension_numbers<[1], [0], [0], [1], [0, 0, 1, 1], [], []>} : vector<2x4xbf16>, vector<4x128xbf16>, vector<2x128xf32> -> vector<2x128xf32>
    %434 = arith.addf %422, %433 : vector<2x128xf32>
    %c0_292 = arith.constant 0 : index
    %c0_293 = arith.constant 0 : index
    %435 = vector.load %arg5[%c0_292, %c0_293] : memref<1x128xf32, #tpu.memory_space<vmem>>, vector<1x128xf32>
    %436 = vector.broadcast %435 : vector<1x128xf32> to vector<2x128xf32>
    %437 = arith.addf %434, %436 : vector<2x128xf32>
    %cst_294 = arith.constant 0.000000e+00 : f32
    %438 = vector.broadcast %cst_294 : f32 to vector<2x128xf32>
    %439 = arith.maximumf %437, %438 : vector<2x128xf32>
    %440 = arith.truncf %439 : vector<2x128xf32> to vector<2x128xbf16>
    %c0_295 = arith.constant 0 : index
    %c0_296 = arith.constant 0 : index
    %441 = vector.load %arg6[%c0_295, %c0_296] : memref<128x128xbf16, #tpu.memory_space<vmem>>, vector<128x128xbf16>
    %cst_297 = arith.constant dense<0.000000e+00> : vector<2x128xf32>
    %442 = tpu.matmul %440, %441, %cst_297 {dimension_numbers = #tpu.dot_dimension_numbers<[1], [0], [0], [1], [0, 0, 1, 1], [], []>} : vector<2x128xbf16>, vector<128x128xbf16>, vector<2x128xf32> -> vector<2x128xf32>
    %c0_298 = arith.constant 0 : index
    %c0_299 = arith.constant 0 : index
    %443 = vector.load %arg7[%c0_298, %c0_299] : memref<1x128xf32, #tpu.memory_space<vmem>>, vector<1x128xf32>
    %444 = vector.broadcast %443 : vector<1x128xf32> to vector<2x128xf32>
    %445 = arith.addf %442, %444 : vector<2x128xf32>
    %446 = arith.negf %445 : vector<2x128xf32>
    %447 = math.exp %446 : vector<2x128xf32>
    %cst_300 = arith.constant 1.000000e+00 : f32
    %448 = vector.broadcast %cst_300 : f32 to vector<2x128xf32>
    %449 = arith.addf %448, %447 : vector<2x128xf32>
    %450 = arith.divf %448, %449 : vector<2x128xf32>
    %c0_301 = arith.constant 0 : index
    %c0_302 = arith.constant 0 : index
    %451 = vector.load %arg8[%c0_301, %c0_302] : memref<2x128xf32, #tpu.memory_space<vmem>>, vector<2x128xf32>
    tpu.vector_store %arg8[%c0_301, %c0_302], %450 {strides = array<i32>} : memref<2x128xf32, #tpu.memory_space<vmem>>, vector<2x128xf32>,
    return
  }
  func.func @transform_0(%arg0: i32) -> (i32, i32, i32) {
    %c0_i32 = arith.constant 0 : i32
    %c0_i32_0 = arith.constant 0 : i32
    %c0_i32_1 = arith.constant 0 : i32
    %c0_i32_2 = arith.constant 0 : i32
    return %c0_i32, %c0_i32_0, %c0_i32_1 : i32, i32, i32
  }
  func.func @transform_1(%arg0: i32) -> (i32, i32) {
    %c0_i32 = arith.constant 0 : i32
    %c0_i32_0 = arith.constant 0 : i32
    %c0_i32_1 = arith.constant 0 : i32
    return %c0_i32, %c0_i32_0 : i32, i32
  }
  func.func @transform_2(%arg0: i32) -> (i32, i32) {
    %c0_i32 = arith.constant 0 : i32
    %c0_i32_0 = arith.constant 0 : i32
    %c0_i32_1 = arith.constant 0 : i32
    return %c0_i32, %c0_i32_0 : i32, i32
  }
  func.func @transform_3(%arg0: i32) -> (i32, i32, i32) {
    %c0_i32 = arith.constant 0 : i32
    %c0_i32_0 = arith.constant 0 : i32
    %c0_i32_1 = arith.constant 0 : i32
    %c0_i32_2 = arith.constant 0 : i32
    return %c0_i32, %c0_i32_0, %c0_i32_1 : i32, i32, i32
  }
  func.func @transform_4(%arg0: i32) -> (i32, i32) {
    %c0_i32 = arith.constant 0 : i32
    %c0_i32_0 = arith.constant 0 : i32
    %c0_i32_1 = arith.constant 0 : i32
    return %c0_i32, %c0_i32_0 : i32, i32
  }
  func.func @transform_5(%arg0: i32) -> (i32, i32) {
    %c0_i32 = arith.constant 0 : i32
    %c0_i32_0 = arith.constant 0 : i32
    return %c0_i32, %arg0 : i32, i32
  }
  func.func @transform_6(%arg0: i32) -> (i32, i32) {
    %c0_i32 = arith.constant 0 : i32
    %c0_i32_0 = arith.constant 0 : i32
    return %c0_i32, %arg0 : i32, i32
  }
  func.func @transform_7(%arg0: i32) -> (i32, i32) {
    %c0_i32 = arith.constant 0 : i32
    %c0_i32_0 = arith.constant 0 : i32
    return %c0_i32, %arg0 : i32, i32
  }
}

</mosaic_0001>

<bundles_post_ra>
// kernel: tpu_custom_call.1
= control target key start
LH: loop header
LB: loop body
LE: loop exit
PB: predicated region body
PF: predicated region fallthrough
CT: control target
= control target key end

     0   :  { %12 = vsyncpa [#allocation3], 0  ;;  %s5126_s0 = inlined_call_operand.vmem [shape: bf16[36,2,9], index: 0, kind: input, shape index: {}]   ;;  %s5127_s1 = inlined_call_operand.vmem [shape: bf16[9,4], index: 1, kind: input, shape index: {}]   ;;  %s5128_s2 = inlined_call_operand.hbm [shape: f32[1,4], index: 2, kind: input, shape index: {}]   ;;  %s5129_s3 = inlined_call_operand.hbm [shape: bf16[36,4,128], index: 3, kind: input, shape index: {}]   ;;  %s5130_s4 = inlined_call_operand.hbm [shape: f32[1,128], index: 4, kind: input, shape index: {}]   ;;  %s5131_s5 = inlined_call_operand.vmem [shape: bf16[128,128], index: 5, kind: input, shape index: {}]   ;;  %s5132_s6 = inlined_call_operand.vmem [shape: f32[1,128], index: 6, kind: input, shape index: {}]   ;;  %s5133_s7 = inlined_call_operand.hbm [shape: f32[2,128], index: 7, kind: output, shape index: {}]  }
   0x1   :  { %13 = vsyncpa [#allocation6], 0 }
   0x2   :  { %14 = vsyncpa [#allocation4], 0  ;;  %s4519_s24 = smov [#allocation5]  }
   0x3   :  { %s34_s25 = sshll.u32 %s4519_s24, 4  ;;  %s35_s25 = int_to_ptr.vmem [resolvable:$true] %s34_s25 }
   0x4   :  { %s4441_s26 = scalar_lea.vmem %s35_s25, 1152  ;;  %p4446_p1 = scmp.lt.s32.totalorder %s35_s25, %s35_s25 }
   0x5   :  { %p4442_p0 = scmp.ne.s32.totalorder %s35_s25, %s4441_s26  ;;  %p4447_p2 = scmp.lt.s32.totalorder %s4441_s26, %s4441_s26 }
   0x7   :  { %p4448_p3 = por %p4447_p2, %p4446_p1 }
   0x9   :  { %p4449_p4 = pnand %p4448_p3, %p4442_p0 }
   0xb   :  { %4452 = shalt.err (!%p4449_p4)
}
   0xc   :  { %s4520_s27 = smov 32   ;;  %s4521_s28 = smov 2  }
   0xd   :  { %40 = dma.hbm_to_vmem [thread:$0]  %s5129_s3, 1152, %s35_s25, [#allocation6], %s4520_s27, %s4520_s27, %s4521_s28  }
   0xe   :  { %s4522_s8 = smov [#allocation2]   ;;  %s4523_s10 = smov [#allocation7]  }
   0xf   :  { %s25_s9 = sshll.u32 %s4522_s8, 4  ;;  %s47_s11 = sshll.u32 %s4523_s10, 4  ;;  %s26_s9 = int_to_ptr.vmem [resolvable:$true] %s25_s9  ;;  %s48_s11 = int_to_ptr.vmem [resolvable:$true] %s47_s11 }
  0x10   :  { %s4461_s12 = scalar_lea.vmem %s26_s9, 16  ;;  %s4465_s13 = scalar_lea.vmem %s26_s9, 32 }
  0x11   :  { %p4462_p5 = scmp.ne.s32.totalorder %s26_s9, %s4461_s12  ;;  %p4466_p6 = scmp.lt.s32.totalorder %s26_s9, %s26_s9 }
  0x12   :  { %p4467_p7 = scmp.lt.s32.totalorder %s4465_s13, %s4461_s12 }
  0x14   :  { %p4468_p8 = por %p4467_p7, %p4466_p6 }
  0x16   :  { %p4469_p9 = pnand %p4468_p8, %p4462_p5 }
  0x18   :  { %4472 = shalt.err (!%p4469_p9)
}
  0x19   :  { %28 = dma.hbm_to_vmem [thread:$0]  %s5128_s2, 16, %s26_s9, [#allocation3]  }
  0x1a   :  { %s4481_s16 = scalar_lea.vmem %s48_s11, 16  ;;  %s4485_s3 = scalar_lea.vmem %s48_s11, 32 }
  0x1b   :  { %p4482_p10 = scmp.ne.s32.totalorder %s48_s11, %s4481_s16  ;;  %p4486_p11 = scmp.lt.s32.totalorder %s48_s11, %s48_s11 }
  0x1c   :  { %p4487_p12 = scmp.lt.s32.totalorder %s4485_s3, %s4481_s16 }
  0x1e   :  { %p4488_p13 = por %p4487_p12, %p4486_p11 }
  0x20   :  { %p4489_p0 = pnand %p4488_p13, %p4482_p10 }
  0x22   :  { %4492 = shalt.err (!%p4489_p0)
}
  0x23   :  { %50 = dma.hbm_to_vmem [thread:$0]  %s5130_s4, 16, %s48_s11, [#allocation6]  }
  0x24   :  { %4513 = dma.done.wait [#allocation3], 16  }
  0x25   :  { %4514 = vsyncadd [#allocation3], 4294967280 }
  0x26   :  { %4515 = dma.done.wait [#allocation6], 1168  }
  0x27   :  { %4516 = vsyncadd [#allocation6], 4294966128  ;;  %vm84_vm0 = vcmask 1043456   ;;  %v4524_v0 = vmov 0.0   ;;  %vm4525_vm1 = vmmov 0   ;;  %vm85_vm2 = vcmask 1044480  }
  0x28   :  { %3958 = vmatprep.subr.bf16.mxu1 %v4524_v0  ;;  %3982 = vmatprep.subr.bf16.mxu0 %v4524_v0  ;;  %v4526_v1 = vmov 65535   ;;  %v4419_v4 = vld [vmem:[%s5127_s1] sm:$0x1f]   ;;  %vm80_vm3 = vcmask 72704   ;;  %v3701_v11 = vld [vmem:[%s5126_s0 + $0x5] sm:$0x1] }
  0x29   :  { %3960 = vmatprep.mubr.msk.bf16.mxu1 %vm4525_vm1, %v4524_v0  ;;  %3984 = vmatprep.mubr.msk.bf16.mxu0 %vm4525_vm1, %v4524_v0  ;;  %v86_v2 = vsel %vm84_vm0, 4294967295, %v4526_v1  ;;  %v68_v6 = vld [vmem:[%s5126_s0] sm:$0x1]  ;;  %v3692_v7 = vld [vmem:[%s5126_s0 + $0x2] sm:$0x1]  ;;  %vm187_vm4 = vcmask 1041408  }
  0x2a   :  { %v87_v3 = vsel %vm85_vm2, %v86_v2, 0  ;;  %v3688_v8 = vld [vmem:[%s5126_s0 + $0x1] sm:$0x1]  ;;  %v3695_v9 = vld [vmem:[%s5126_s0 + $0x3] sm:$0x1]  ;;  %vm183_vm5 = vcmask 31744  }
  0x2b   :  { %v4586_v5 = vand.u32 %v4419_v4, %v87_v3  ;;  %v3698_v10 = vld [vmem:[%s5126_s0 + $0x4] sm:$0x1]  ;;  %v3704_v12 = vld [vmem:[%s5126_s0 + $0x6] sm:$0x1]  ;;  %v3707_v13 = vld [vmem:[%s5126_s0 + $0x7] sm:$0x1] }
  0x2c   :  { %v3710_v14 = vld [vmem:[%s5126_s0 + $0x8] sm:$0x1]  ;;  %v3713_v15 = vld [vmem:[%s5126_s0 + $0x9] sm:$0x1]  ;;  %v3716_v16 = vld [vmem:[%s5126_s0 + $0xa] sm:$0x1] }
  0x2d   :  { %3959 = vmatpush3.bf16.msra.mxu1 %v4586_v5  ;;  %3983 = vmatpush3.bf16.msra.mxu0 %v4586_v5  ;;  %v3719_v17 = vld [vmem:[%s5126_s0 + $0xb] sm:$0x1]  ;;  %v182_v18 = vld [vmem:[#allocation5 + $0x2] sm:$0x3]  ;;  %v3722_v20 = vld [vmem:[%s5126_s0 + $0xc] sm:$0x1] }
  0x2e   :  { %3964 = vmatprep.subr.bf16.mxu1 %v4524_v0  ;;  %3994 = vmatprep.subr.bf16.mxu0 %v4524_v0  ;;  %v189_v19 = vsel %vm187_vm4, %v182_v18, 0  ;;  %v3725_v21 = vld [vmem:[%s5126_s0 + $0xd] sm:$0x1]  ;;  %v3728_v22 = vld [vmem:[%s5126_s0 + $0xe] sm:$0x1]  ;;  %s4527_s25 = smov [#allocation8]  }
  0x2f   :  { %v3731_v23 = vld [vmem:[%s5126_s0 + $0xf] sm:$0x1]  ;;  %v3734_v24 = vld [vmem:[%s5126_s0 + $0x10] sm:$0x1]  ;;  %v3737_v25 = vld [vmem:[%s5126_s0 + $0x11] sm:$0x1] }
  0x30   :  { %3961 = vmatmul.mubr.msk.bf16.vlgmr.msra.gmra.mxu1 %vm80_vm3, %v68_v6  ;;  %3985 = vmatmul.mubr.msk.bf16.vlgmr.msra.gmra.mxu0 %vm80_vm3, %v3692_v7  ;;  %v3740_v26 = vld [vmem:[%s5126_s0 + $0x12] sm:$0x1]  ;;  %v3743_v27 = vld [vmem:[%s5126_s0 + $0x13] sm:$0x1]  ;;  %v3746_v28 = vld [vmem:[%s5126_s0 + $0x14] sm:$0x1] }
  0x31   :  { %3965 = vmatpush3.bf16.msra.mxu1 %v4586_v5  ;;  %3966 = vmatprep.mubr.msk.bf16.mxu1 %vm4525_vm1, %v4524_v0  ;;  %v3749_v29 = vld [vmem:[%s5126_s0 + $0x15] sm:$0x1]  ;;  %v3752_v30 = vld [vmem:[%s5126_s0 + $0x16] sm:$0x1]  ;;  %v3755_v31 = vld [vmem:[%s5126_s0 + $0x17] sm:$0x1] }
  0x32   :  { %3995 = vmatpush3.bf16.msra.mxu0 %v4586_v5  ;;  %3996 = vmatprep.mubr.msk.bf16.mxu0 %vm4525_vm1, %v4524_v0  ;;  %v3758_v32 = vld [vmem:[%s5126_s0 + $0x18] sm:$0x1]  ;;  %v3761_v33 = vld [vmem:[%s5126_s0 + $0x19] sm:$0x1]  ;;  %v3764_v34 = vld [vmem:[%s5126_s0 + $0x1a] sm:$0x1] }
  0x33   :  { %4006 = vmatprep.subr.bf16.mxu0 %v4524_v0  ;;  %3970 = vmatprep.subr.bf16.mxu1 %v4524_v0  ;;  %v3767_v41 = vld [vmem:[%s5126_s0 + $0x1b] sm:$0x1]  ;;  %v4811_v44 = vld [vmem:[#allocation2] ss:$0 sm:$0xff]  ;;  %v133_v49 = vld [vmem:[#allocation5] sm:$0x3] }
  0x34   :  { %v235_v56 = vsel %vm187_vm4, %v133_v49, 0  ;;  %v3770_v59 = vld [vmem:[%s5126_s0 + $0x1c] sm:$0x1]  ;;  %v325_v62 = vld [vmem:[#allocation5 + $0x4] sm:$0x3]  ;;  %s3675_s26 = sshll.u32 %s4527_s25, 4  ;;  %s3676_s26 = int_to_ptr.vmem [resolvable:$true] %s3675_s26 }
  0x35   :  { %v330_v4 = vsel %vm187_vm4, %v325_v62, 0  ;;  %v3773_v7 = vld [vmem:[%s5126_s0 + $0x1d] sm:$0x1]  ;;  %s4493_s27 = scalar_lea.vmem %s3676_s26, 32  ;;  %p4498_p2 = scmp.lt.s32.totalorder %s3676_s26, %s3676_s26 }
  0x36   :  { %p4494_p1 = scmp.ne.s32.totalorder %s3676_s26, %s4493_s27  ;;  %p4499_p3 = scmp.lt.s32.totalorder %s4493_s27, %s4493_s27 }
  0x38   :  { %3967 = vmatmul.mubr.msk.bf16.vlgmr.msra.gmra.mxu1 %vm80_vm3, %v3688_v8  ;;  %3997 = vmatmul.mubr.msk.bf16.vlgmr.msra.gmra.mxu0 %vm80_vm3, %v3695_v9  ;;  %p4500_p4 = por %p4499_p3, %p4498_p2 }
  0x39   :  { %4007 = vmatpush3.bf16.msra.mxu0 %v4586_v5  ;;  %4008 = vmatprep.mubr.msk.bf16.mxu0 %vm4525_vm1, %v4524_v0 }
  0x3a   :  { %4018 = vmatprep.subr.bf16.mxu0 %v4524_v0  ;;  %3972 = vmatprep.mubr.msk.bf16.mxu1 %vm4525_vm1, %v4524_v0  ;;  %p4501_p5 = pnand %p4500_p4, %p4494_p1 }
  0x3b   :  { %3971 = vmatpush3.bf16.msra.mxu1 %v189_v19 }
  0x3c   :  { %3976 = vmatprep.subr.bf16.mxu1 %v4524_v0 }
  0x40   :  { %4009 = vmatmul.mubr.msk.bf16.vlgmr.msra.gmra.mxu0 %vm80_vm3, %v3698_v10  ;;  %v421_v10 = vld [vmem:[#allocation5 + $0x6] sm:$0x3] }
  0x41   :  { %4019 = vmatpush3.bf16.msra.mxu0 %v4586_v5  ;;  %4020 = vmatprep.mubr.msk.bf16.mxu0 %vm4525_vm1, %v4524_v0 }
  0x42   :  { %4030 = vmatprep.subr.bf16.mxu0 %v4524_v0 }
  0x48   :  { %4021 = vmatmul.mubr.msk.bf16.vlgmr.msra.gmra.mxu0 %vm80_vm3, %v3701_v11 }
  0x49   :  { %4031 = vmatpush3.bf16.msra.mxu0 %v4586_v5  ;;  %4032 = vmatprep.mubr.msk.bf16.mxu0 %vm4525_vm1, %v4524_v0 }
  0x4a   :  { %4042 = vmatprep.subr.bf16.mxu0 %v4524_v0 }
  0x50   :  { %4033 = vmatmul.mubr.msk.bf16.vlgmr.msra.gmra.mxu0 %vm80_vm3, %v3704_v12 }
  0x51   :  { %4043 = vmatpush3.bf16.msra.mxu0 %v4586_v5  ;;  %4044 = vmatprep.mubr.msk.bf16.mxu0 %vm4525_vm1, %v4524_v0 }
  0x52   :  { %4054 = vmatprep.subr.bf16.mxu0 %v4524_v0 }
  0x58   :  { %4045 = vmatmul.mubr.msk.bf16.vlgmr.msra.gmra.mxu0 %vm80_vm3, %v3707_v13 }
  0x59   :  { %4055 = vmatpush3.bf16.msra.mxu0 %v4586_v5  ;;  %4056 = vmatprep.mubr.msk.bf16.mxu0 %vm4525_vm1, %v4524_v0 }
  0x5a   :  { %4066 = vmatprep.subr.bf16.mxu0 %v4524_v0 }
  0x60   :  { %4057 = vmatmul.mubr.msk.bf16.vlgmr.msra.gmra.mxu0 %vm80_vm3, %v3710_v14 }
  0x61   :  { %4067 = vmatpush3.bf16.msra.mxu0 %v4586_v5  ;;  %4068 = vmatprep.mubr.msk.bf16.mxu0 %vm4525_vm1, %v4524_v0 }
  0x62   :  { %4078 = vmatprep.subr.bf16.mxu0 %v4524_v0 }
  0x68   :  { %4069 = vmatmul.mubr.msk.bf16.vlgmr.msra.gmra.mxu0 %vm80_vm3, %v3713_v15  ;;  %v426_v15 = vsel %vm187_vm4, %v421_v10, 0 }
  0x69   :  { %4079 = vmatpush3.bf16.msra.mxu0 %v4586_v5  ;;  %4080 = vmatprep.mubr.msk.bf16.mxu0 %vm4525_vm1, %v4524_v0 }
  0x6a   :  { %4090 = vmatprep.subr.bf16.mxu0 %v4524_v0 }
  0x70   :  { %4081 = vmatmul.mubr.msk.bf16.vlgmr.msra.gmra.mxu0 %vm80_vm3, %v3716_v16 }
  0x71   :  { %4091 = vmatpush3.bf16.msra.mxu0 %v4586_v5  ;;  %4092 = vmatprep.mubr.msk.bf16.mxu0 %vm4525_vm1, %v4524_v0 }
  0x72   :  { %4102 = vmatprep.subr.bf16.mxu0 %v4524_v0 }
  0x78   :  { %4093 = vmatmul.mubr.msk.bf16.vlgmr.msra.gmra.mxu0 %vm80_vm3, %v3719_v17  ;;  %v3776_v17 = vld [vmem:[%s5126_s0 + $0x1e] sm:$0x1] }
  0x79   :  { %4103 = vmatpush3.bf16.msra.mxu0 %v4586_v5  ;;  %4104 = vmatprep.mubr.msk.bf16.mxu0 %vm4525_vm1, %v4524_v0 }
  0x7a   :  { %4114 = vmatprep.subr.bf16.mxu0 %v4524_v0 }
  0x80   :  { %4105 = vmatmul.mubr.msk.bf16.vlgmr.msra.gmra.mxu0 %vm80_vm3, %v3722_v20  ;;  %v517_v20 = vld [vmem:[#allocation5 + $0x8] sm:$0x3] }
  0x81   :  { %4115 = vmatpush3.bf16.msra.mxu0 %v4586_v5  ;;  %4116 = vmatprep.mubr.msk.bf16.mxu0 %vm4525_vm1, %v4524_v0 }
  0x82   :  { %4126 = vmatprep.subr.bf16.mxu0 %v4524_v0 }
  0x88   :  { %4117 = vmatmul.mubr.msk.bf16.vlgmr.msra.gmra.mxu0 %vm80_vm3, %v3725_v21 }
  0x89   :  { %4127 = vmatpush3.bf16.msra.mxu0 %v4586_v5  ;;  %4128 = vmatprep.mubr.msk.bf16.mxu0 %vm4525_vm1, %v4524_v0 }
  0x8a   :  { %4138 = vmatprep.subr.bf16.mxu0 %v4524_v0 }
  0x90   :  { %4129 = vmatmul.mubr.msk.bf16.vlgmr.msra.gmra.mxu0 %vm80_vm3, %v3728_v22 }
  0x91   :  { %4139 = vmatpush3.bf16.msra.mxu0 %v4586_v5  ;;  %4140 = vmatprep.mubr.msk.bf16.mxu0 %vm4525_vm1, %v4524_v0 }
  0x92   :  { %4150 = vmatprep.subr.bf16.mxu0 %v4524_v0 }
  0x98   :  { %4141 = vmatmul.mubr.msk.bf16.vlgmr.msra.gmra.mxu0 %vm80_vm3, %v3731_v23 }
  0x99   :  { %4151 = vmatpush3.bf16.msra.mxu0 %v4586_v5  ;;  %4152 = vmatprep.mubr.msk.bf16.mxu0 %vm4525_vm1, %v4524_v0 }
  0x9a   :  { %4162 = vmatprep.subr.bf16.mxu0 %v4524_v0 }
  0xa0   :  { %4153 = vmatmul.mubr.msk.bf16.vlgmr.msra.gmra.mxu0 %vm80_vm3, %v3734_v24 }
  0xa1   :  { %4163 = vmatpush3.bf16.msra.mxu0 %v4586_v5  ;;  %4164 = vmatprep.mubr.msk.bf16.mxu0 %vm4525_vm1, %v4524_v0 }
  0xa2   :  { %4174 = vmatprep.subr.bf16.mxu0 %v4524_v0 }
  0xa8   :  { %4165 = vmatmul.mubr.msk.bf16.vlgmr.msra.gmra.mxu0 %vm80_vm3, %v3737_v25  ;;  %v522_v25 = vsel %vm187_vm4, %v517_v20, 0 }
  0xa9   :  { %4175 = vmatpush3.bf16.msra.mxu0 %v4586_v5  ;;  %4176 = vmatprep.mubr.msk.bf16.mxu0 %vm4525_vm1, %v4524_v0 }
  0xaa   :  { %4186 = vmatprep.subr.bf16.mxu0 %v4524_v0 }
  0xb0   :  { %4177 = vmatmul.mubr.msk.bf16.vlgmr.msra.gmra.mxu0 %vm80_vm3, %v3740_v26 }
  0xb1   :  { %4187 = vmatpush3.bf16.msra.mxu0 %v4586_v5  ;;  %4188 = vmatprep.mubr.msk.bf16.mxu0 %vm4525_vm1, %v4524_v0 }
  0xb2   :  { %4198 = vmatprep.subr.bf16.mxu0 %v4524_v0 }
  0xb8   :  { %4189 = vmatmul.mubr.msk.bf16.vlgmr.msra.gmra.mxu0 %vm80_vm3, %v3743_v27  ;;  %v3779_v27 = vld [vmem:[%s5126_s0 + $0x1f] sm:$0x1] }
  0xb9   :  { %4199 = vmatpush3.bf16.msra.mxu0 %v4586_v5  ;;  %4200 = vmatprep.mubr.msk.bf16.mxu0 %vm4525_vm1, %v4524_v0 }
  0xba   :  { %4210 = vmatprep.subr.bf16.mxu0 %v4524_v0 }
  0xc0   :  { %4201 = vmatmul.mubr.msk.bf16.vlgmr.msra.gmra.mxu0 %vm80_vm3, %v3746_v28 }
  0xc1   :  { %4211 = vmatpush3.bf16.msra.mxu0 %v4586_v5  ;;  %4212 = vmatprep.mubr.msk.bf16.mxu0 %vm4525_vm1, %v4524_v0 }
  0xc2   :  { %4222 = vmatprep.subr.bf16.mxu0 %v4524_v0 }
  0xc8   :  { %4213 = vmatmul.mubr.msk.bf16.vlgmr.msra.gmra.mxu0 %vm80_vm3, %v3749_v29 }
  0xc9   :  { %4223 = vmatpush3.bf16.msra.mxu0 %v4586_v5  ;;  %4224 = vmatprep.mubr.msk.bf16.mxu0 %vm4525_vm1, %v4524_v0 }
  0xca   :  { %4234 = vmatprep.subr.bf16.mxu0 %v4524_v0 }
  0xd0   :  { %4225 = vmatmul.mubr.msk.bf16.vlgmr.msra.gmra.mxu0 %vm80_vm3, %v3752_v30  ;;  %v613_v30 = vld [vmem:[#allocation5 + $0xa] sm:$0x3] }
  0xd1   :  { %4235 = vmatpush3.bf16.msra.mxu0 %v4586_v5  ;;  %4236 = vmatprep.mubr.msk.bf16.mxu0 %vm4525_vm1, %v4524_v0 }
  0xd2   :  { %4246 = vmatprep.subr.bf16.mxu0 %v4524_v0 }
  0xd8   :  { %4237 = vmatmul.mubr.msk.bf16.vlgmr.msra.gmra.mxu0 %vm80_vm3, %v3755_v31 }
  0xd9   :  { %4247 = vmatpush3.bf16.msra.mxu0 %v4586_v5  ;;  %4248 = vmatprep.mubr.msk.bf16.mxu0 %vm4525_vm1, %v4524_v0 }
  0xda   :  { %4258 = vmatprep.subr.bf16.mxu0 %v4524_v0 }
  0xe0   :  { %4249 = vmatmul.mubr.msk.bf16.vlgmr.msra.gmra.mxu0 %vm80_vm3, %v3758_v32 }
  0xe1   :  { %4259 = vmatpush3.bf16.msra.mxu0 %v4586_v5  ;;  %4260 = vmatprep.mubr.msk.bf16.mxu0 %vm4525_vm1, %v4524_v0 }
  0xe2   :  { %4270 = vmatprep.subr.bf16.mxu0 %v4524_v0 }
  0xe8   :  { %4261 = vmatmul.mubr.msk.bf16.vlgmr.msra.gmra.mxu0 %vm80_vm3, %v3761_v33 }
  0xe9   :  { %4271 = vmatpush3.bf16.msra.mxu0 %v4586_v5  ;;  %4272 = vmatprep.mubr.msk.bf16.mxu0 %vm4525_vm1, %v4524_v0 }
  0xea   :  { %4282 = vmatprep.subr.bf16.mxu0 %v4524_v0 }
  0xf0   :  { %v125_v35 = vpop.f32.mrf.mxu1  ;;  %v316_v36 = vpop.f32.mrf.mxu0  ;;  %4273 = vmatmul.mubr.msk.bf16.vlgmr.msra.gmra.mxu0 %vm80_vm3, %v3764_v34 }
  0xf1   :  { %4283 = vmatpush3.bf16.msra.mxu0 %v4586_v5  ;;  %4284 = vmatprep.mubr.msk.bf16.mxu0 %vm4525_vm1, %v4524_v0  ;;  %v126_v54 = vadd.f32 %v4811_v44, %v125_v35  ;;  %v317_v1 = vadd.f32 %v4811_v44, %v316_v36  ;;  %v618_v35 = vsel %vm187_vm4, %v613_v30, 0 }
  0xf2   :  { %v3962_v37 = vpop.f32.mrf.mxu1  ;;  %v3986_v38 = vpop.f32.mrf.mxu0  ;;  %4294 = vmatprep.subr.bf16.mxu0 %v4524_v0 }
  0xf3   :  { %v131_v61 = vmax.f32 %v126_v54, 0.0  ;;  %v322_v8 = vmax.f32 %v317_v1, 0.0  ;;  %v3782_v37 = vld [vmem:[%s5126_s0 + $0x20] sm:$0x1] }
  0xf4   :  { %v128_v39 = vpop.f32.mrf.mxu1  ;;  %v319_v40 = vpop.f32.mrf.mxu0 }
  0xf5   :  { %v132_v3 = vpack.c.bf16 %v131_v61, %v131_v61  ;;  %v323_v12 = vpack.c.bf16 %v322_v8, %v322_v8  ;;  %v709_v40 = vld [vmem:[#allocation5 + $0xc] sm:$0x3]  ;;  %v901_v61 = vld [vmem:[#allocation5 + $0x10] sm:$0x3]  ;;  %v997_v8 = vld [vmem:[#allocation5 + $0x12] sm:$0x3] }
  0xf6   :  { %v3963_v42 = vpop.f32.mrf.mxu1  ;;  %v3987_v43 = vpop.f32.mrf.mxu0 }
  0xf8   :  { %v173_v45 = vpop.f32.mrf.mxu1  ;;  %v412_v46 = vpop.f32.mrf.mxu0  ;;  %4285 = vmatmul.mubr.msk.bf16.vlgmr.msra.gmra.mxu0 %vm80_vm3, %v3767_v41 }
  0xf9   :  { %v174_v47 = vadd.f32 %v4811_v44, %v173_v45  ;;  %4295 = vmatpush3.bf16.msra.mxu0 %v4586_v5  ;;  %4296 = vmatprep.mubr.msk.bf16.mxu0 %vm4525_vm1, %v4524_v0  ;;  %v413_v13 = vadd.f32 %v4811_v44, %v412_v46  ;;  %v714_v46 = vsel %vm187_vm4, %v709_v40, 0 }
  0xfa   :  { %v3968_v48 = vpop.f32.mrf.mxu1  ;;  %v3998_v50 = vpop.f32.mrf.mxu0  ;;  %4306 = vmatprep.subr.bf16.mxu0 %v4524_v0 }
  0xfb   :  { %v179_v51 = vmax.f32 %v174_v47, 0.0  ;;  %v418_v18 = vmax.f32 %v413_v13, 0.0  ;;  %v3785_v48 = vld [vmem:[%s5126_s0 + $0x21] sm:$0x1]  ;;  %v1002_v13 = vsel %vm187_vm4, %v997_v8, 0 }
  0xfc   :  { %v176_v52 = vpop.f32.mrf.mxu1  ;;  %v415_v53 = vpop.f32.mrf.mxu0 }
  0xfd   :  { %v180_v55 = vpack.c.bf16 %v179_v51, %v179_v51  ;;  %v419_v22 = vpack.c.bf16 %v418_v18, %v418_v18  ;;  %v805_v51 = vld [vmem:[#allocation5 + $0xe] sm:$0x3] }
  0xfe   :  { %v3969_v57 = vpop.f32.mrf.mxu1  ;;  %v3999_v58 = vpop.f32.mrf.mxu0 }
  0xff   :  { %3973 = vmatmul.mubr.msk.bf16.vlgmr.msra.gmra.mxu1 %vm183_vm5, %v180_v55  ;;  %v3788_v58 = vld [vmem:[%s5126_s0 + $0x22] sm:$0x1] }
 0x100   :  { %3977 = vmatpush3.bf16.msra.mxu1 %v235_v56  ;;  %3978 = vmatprep.mubr.msk.bf16.mxu1 %vm4525_vm1, %v4524_v0  ;;  %v508_v60 = vpop.f32.mrf.mxu0  ;;  %v810_v56 = vsel %vm187_vm4, %v805_v51, 0 }
 0x101   :  { %3988 = vmatprep.subr.bf16.mxu1 %v4524_v0  ;;  %4297 = vmatmul.mubr.msk.bf16.vlgmr.msra.gmra.mxu0 %vm80_vm3, %v3770_v59  ;;  %v509_v23 = vadd.f32 %v4811_v44, %v508_v60 }
 0x102   :  { %v4010_v63 = vpop.f32.mrf.mxu0  ;;  %4307 = vmatpush3.bf16.msra.mxu0 %v4586_v5  ;;  %4308 = vmatprep.mubr.msk.bf16.mxu0 %vm4525_vm1, %v4524_v0 }
 0x103   :  { %4318 = vmatprep.subr.bf16.mxu0 %v4524_v0  ;;  %v514_v28 = vmax.f32 %v509_v23, 0.0 }
 0x104   :  { %v511_v2 = vpop.f32.mrf.mxu0 }
 0x105   :  { %v515_v32 = vpack.c.bf16 %v514_v28, %v514_v28 }
 0x106   :  { %v4011_v6 = vpop.f32.mrf.mxu0 }
 0x107   :  { %3979 = vmatmul.mubr.msk.bf16.vlgmr.msra.gmra.mxu1 %vm183_vm5, %v132_v3  ;;  %v906_v3 = vsel %vm187_vm4, %v901_v61, 0  ;;  %v3791_v6 = vld [vmem:[%s5126_s0 + $0x23] sm:$0x1] }
 0x108   :  { %3989 = vmatpush3.bf16.msra.mxu1 %v330_v4  ;;  %3990 = vmatprep.mubr.msk.bf16.mxu1 %vm4525_vm1, %v4524_v0  ;;  %v604_v9 = vpop.f32.mrf.mxu0 }
 0x109   :  { %4000 = vmatprep.subr.bf16.mxu1 %v4524_v0  ;;  %4309 = vmatmul.mubr.msk.bf16.vlgmr.msra.gmra.mxu0 %vm80_vm3, %v3773_v7  ;;  %v605_v33 = vadd.f32 %v4811_v44, %v604_v9 }
 0x10a   :  { %v4022_v11 = vpop.f32.mrf.mxu0  ;;  %4319 = vmatpush3.bf16.msra.mxu0 %v4586_v5  ;;  %4320 = vmatprep.mubr.msk.bf16.mxu0 %vm4525_vm1, %v4524_v0 }
 0x10b   :  { %4330 = vmatprep.subr.bf16.mxu0 %v4524_v0  ;;  %v610_v38 = vmax.f32 %v605_v33, 0.0 }
 0x10c   :  { %v607_v14 = vpop.f32.mrf.mxu0 }
 0x10d   :  { %v611_v42 = vpack.c.bf16 %v610_v38, %v610_v38 }
 0x10e   :  { %v4023_v16 = vpop.f32.mrf.mxu0 }
 0x10f   :  { %3991 = vmatmul.mubr.msk.bf16.vlgmr.msra.gmra.mxu1 %vm183_vm5, %v323_v12 }
 0x110   :  { %4001 = vmatpush3.bf16.msra.mxu1 %v426_v15  ;;  %4002 = vmatprep.mubr.msk.bf16.mxu1 %vm4525_vm1, %v4524_v0  ;;  %v700_v19 = vpop.f32.mrf.mxu0 }
 0x111   :  { %4012 = vmatprep.subr.bf16.mxu1 %v4524_v0  ;;  %4321 = vmatmul.mubr.msk.bf16.vlgmr.msra.gmra.mxu0 %vm80_vm3, %v3776_v17  ;;  %v701_v43 = vadd.f32 %v4811_v44, %v700_v19  ;;  %v1093_v17 = vld [vmem:[#allocation5 + $0x14] sm:$0x3] }
 0x112   :  { %v4034_v21 = vpop.f32.mrf.mxu0  ;;  %4331 = vmatpush3.bf16.msra.mxu0 %v4586_v5  ;;  %4332 = vmatprep.mubr.msk.bf16.mxu0 %vm4525_vm1, %v4524_v0 }
 0x113   :  { %4342 = vmatprep.subr.bf16.mxu0 %v4524_v0  ;;  %v706_v49 = vmax.f32 %v701_v43, 0.0 }
 0x114   :  { %v703_v24 = vpop.f32.mrf.mxu0 }
 0x115   :  { %v707_v53 = vpack.c.bf16 %v706_v49, %v706_v49 }
 0x116   :  { %v4035_v26 = vpop.f32.mrf.mxu0 }
 0x117   :  { %4003 = vmatmul.mubr.msk.bf16.vlgmr.msra.gmra.mxu1 %vm183_vm5, %v419_v22  ;;  %v1098_v22 = vsel %vm187_vm4, %v1093_v17, 0  ;;  %v1189_v26 = vld [vmem:[#allocation5 + $0x16] sm:$0x3] }
 0x118   :  { %4013 = vmatpush3.bf16.msra.mxu1 %v522_v25  ;;  %4014 = vmatprep.mubr.msk.bf16.mxu1 %vm4525_vm1, %v4524_v0  ;;  %v796_v29 = vpop.f32.mrf.mxu0 }
 0x119   :  { %4024 = vmatprep.subr.bf16.mxu1 %v4524_v0  ;;  %4333 = vmatmul.mubr.msk.bf16.vlgmr.msra.gmra.mxu0 %vm80_vm3, %v3779_v27  ;;  %v797_v54 = vadd.f32 %v4811_v44, %v796_v29 }
 0x11a   :  { %v4046_v31 = vpop.f32.mrf.mxu0  ;;  %4343 = vmatpush3.bf16.msra.mxu0 %v4586_v5  ;;  %4344 = vmatprep.mubr.msk.bf16.mxu0 %vm4525_vm1, %v4524_v0 }
 0x11b   :  { %4354 = vmatprep.subr.bf16.mxu0 %v4524_v0  ;;  %v802_v59 = vmax.f32 %v797_v54, 0.0  ;;  %v1194_v31 = vsel %vm187_vm4, %v1189_v26, 0  ;;  %v1477_v54 = vld [vmem:[#allocation5 + $0x1c] sm:$0x3] }
 0x11c   :  { %v799_v34 = vpop.f32.mrf.mxu0 }
 0x11d   :  { %v803_v63 = vpack.c.bf16 %v802_v59, %v802_v59  ;;  %v1482_v59 = vsel %vm187_vm4, %v1477_v54, 0 }
 0x11e   :  { %v4047_v36 = vpop.f32.mrf.mxu0 }
 0x11f   :  { %4015 = vmatmul.mubr.msk.bf16.vlgmr.msra.gmra.mxu1 %vm183_vm5, %v515_v32 }
 0x120   :  { %4025 = vmatpush3.bf16.msra.mxu1 %v618_v35  ;;  %4026 = vmatprep.mubr.msk.bf16.mxu1 %vm4525_vm1, %v4524_v0  ;;  %v892_v39 = vpop.f32.mrf.mxu0  ;;  %v1285_v35 = vld [vmem:[#allocation5 + $0x18] sm:$0x3] }
 0x121   :  { %4036 = vmatprep.subr.bf16.mxu1 %v4524_v0  ;;  %4345 = vmatmul.mubr.msk.bf16.vlgmr.msra.gmra.mxu0 %vm80_vm3, %v3782_v37  ;;  %v893_v1 = vadd.f32 %v4811_v44, %v892_v39  ;;  %v1290_v40 = vsel %vm187_vm4, %v1285_v35, 0 }
 0x122   :  { %v4058_v41 = vpop.f32.mrf.mxu0  ;;  %4355 = vmatpush3.bf16.msra.mxu0 %v4586_v5  ;;  %4356 = vmatprep.mubr.msk.bf16.mxu0 %vm4525_vm1, %v4524_v0 }
 0x123   :  { %4366 = vmatprep.subr.bf16.mxu0 %v4524_v0  ;;  %v898_v7 = vmax.f32 %v893_v1, 0.0 }
 0x124   :  { %v895_v45 = vpop.f32.mrf.mxu0 }
 0x125   :  { %v899_v10 = vpack.c.bf16 %v898_v7, %v898_v7  ;;  %v1381_v45 = vld [vmem:[#allocation5 + $0x1a] sm:$0x3] }
 0x126   :  { %v4059_v47 = vpop.f32.mrf.mxu0 }
 0x127   :  { %4027 = vmatmul.mubr.msk.bf16.vlgmr.msra.gmra.mxu1 %vm183_vm5, %v611_v42 }
 0x128   :  { %4037 = vmatpush3.bf16.msra.mxu1 %v714_v46  ;;  %4038 = vmatprep.mubr.msk.bf16.mxu1 %vm4525_vm1, %v4524_v0  ;;  %v988_v50 = vpop.f32.mrf.mxu0 }
 0x129   :  { %4048 = vmatprep.subr.bf16.mxu1 %v4524_v0  ;;  %4357 = vmatmul.mubr.msk.bf16.vlgmr.msra.gmra.mxu0 %vm80_vm3, %v3785_v48  ;;  %v989_v11 = vadd.f32 %v4811_v44, %v988_v50  ;;  %v1386_v50 = vsel %vm187_vm4, %v1381_v45, 0 }
 0x12a   :  { %v4070_v52 = vpop.f32.mrf.mxu0  ;;  %4367 = vmatpush3.bf16.msra.mxu0 %v4586_v5  ;;  %4368 = vmatprep.mubr.msk.bf16.mxu0 %vm4525_vm1, %v4524_v0 }
 0x12b   :  { %4378 = vmatprep.subr.bf16.mxu0 %v4524_v0  ;;  %v994_v15 = vmax.f32 %v989_v11, 0.0 }
 0x12c   :  { %v991_v55 = vpop.f32.mrf.mxu0 }
 0x12d   :  { %v995_v19 = vpack.c.bf16 %v994_v15, %v994_v15 }
 0x12e   :  { %v4071_v57 = vpop.f32.mrf.mxu0 }
 0x12f   :  { %4039 = vmatmul.mubr.msk.bf16.vlgmr.msra.gmra.mxu1 %vm183_vm5, %v707_v53 }
 0x130   :  { %4049 = vmatpush3.bf16.msra.mxu1 %v810_v56  ;;  %4050 = vmatprep.mubr.msk.bf16.mxu1 %vm4525_vm1, %v4524_v0  ;;  %v1084_v60 = vpop.f32.mrf.mxu0 }
 0x131   :  { %4060 = vmatprep.subr.bf16.mxu1 %v4524_v0  ;;  %4369 = vmatmul.mubr.msk.bf16.vlgmr.msra.gmra.mxu0 %vm80_vm3, %v3788_v58  ;;  %v1085_v20 = vadd.f32 %v4811_v44, %v1084_v60 }
 0x132   :  { %v4082_v62 = vpop.f32.mrf.mxu0  ;;  %4379 = vmatpush3.bf16.msra.mxu0 %v4586_v5  ;;  %4380 = vmatprep.mubr.msk.bf16.mxu0 %vm4525_vm1, %v4524_v0 }
 0x133   :  { %4390 = vmatprep.subr.bf16.mxu0 %v4524_v0  ;;  %v1090_v24 = vmax.f32 %v1085_v20, 0.0 }
 0x134   :  { %v1087_v2 = vpop.f32.mrf.mxu0 }
 0x135   :  { %v1091_v28 = vpack.c.bf16 %v1090_v24, %v1090_v24 }
 0x136   :  { %v4083_v4 = vpop.f32.mrf.mxu0 }
 0x137   :  { %4051 = vmatmul.mubr.msk.bf16.vlgmr.msra.gmra.mxu1 %vm183_vm5, %v803_v63  ;;  %v1573_v63 = vld [vmem:[#allocation5 + $0x1e] sm:$0x3] }
 0x138   :  { %4061 = vmatpush3.bf16.msra.mxu1 %v906_v3  ;;  %4062 = vmatprep.mubr.msk.bf16.mxu1 %vm4525_vm1, %v4524_v0  ;;  %v1180_v5 = vpop.f32.mrf.mxu0 }
 0x139   :  { %4072 = vmatprep.subr.bf16.mxu1 %v4524_v0  ;;  %4381 = vmatmul.mubr.msk.bf16.vlgmr.msra.gmra.mxu0 %vm80_vm3, %v3791_v6  ;;  %v1181_v29 = vadd.f32 %v4811_v44, %v1180_v5  ;;  %v1578_v6 = vsel %vm187_vm4, %v1573_v63, 0 }
 0x13a   :  { %v4094_v9 = vpop.f32.mrf.mxu0  ;;  %4406 = vmatprep.mubr.msk.bf16.mxu0 %vm4525_vm1, %v4524_v0 }
 0x13b   :  { %v1186_v33 = vmax.f32 %v1181_v29, 0.0  ;;  %v1669_v9 = vld [vmem:[#allocation5 + $0x20] sm:$0x3] }
 0x13c   :  { %v1183_v12 = vpop.f32.mrf.mxu0 }
 0x13d   :  { %v1187_v37 = vpack.c.bf16 %v1186_v33, %v1186_v33 }
 0x13e   :  { %v4095_v14 = vpop.f32.mrf.mxu0 }
 0x13f   :  { %4063 = vmatmul.mubr.msk.bf16.vlgmr.msra.gmra.mxu1 %vm183_vm5, %v899_v10  ;;  %v1674_v14 = vsel %vm187_vm4, %v1669_v9, 0 }
 0x140   :  { %4073 = vmatpush3.bf16.msra.mxu1 %v1002_v13  ;;  %4074 = vmatprep.mubr.msk.bf16.mxu1 %vm4525_vm1, %v4524_v0  ;;  %v1276_v16 = vpop.f32.mrf.mxu0 }
 0x141   :  { %4084 = vmatprep.subr.bf16.mxu1 %v4524_v0  ;;  %v1277_v38 = vadd.f32 %v4811_v44, %v1276_v16 }
 0x142   :  { %v4106_v18 = vpop.f32.mrf.mxu0 }
 0x143   :  { %v1282_v42 = vmax.f32 %v1277_v38, 0.0  ;;  %v1765_v18 = vld [vmem:[#allocation5 + $0x22] sm:$0x3] }
 0x144   :  { %v1279_v21 = vpop.f32.mrf.mxu0 }
 0x145   :  { %v1283_v47 = vpack.c.bf16 %v1282_v42, %v1282_v42 }
 0x146   :  { %v4107_v23 = vpop.f32.mrf.mxu0 }
 0x147   :  { %4075 = vmatmul.mubr.msk.bf16.vlgmr.msra.gmra.mxu1 %vm183_vm5, %v995_v19  ;;  %v1770_v23 = vsel %vm187_vm4, %v1765_v18, 0 }
 0x148   :  { %4085 = vmatpush3.bf16.msra.mxu1 %v1098_v22  ;;  %4086 = vmatprep.mubr.msk.bf16.mxu1 %vm4525_vm1, %v4524_v0  ;;  %v1372_v25 = vpop.f32.mrf.mxu0 }
 0x149   :  { %4096 = vmatprep.subr.bf16.mxu1 %v4524_v0  ;;  %v1373_v48 = vadd.f32 %v4811_v44, %v1372_v25 }
 0x14a   :  { %v4118_v27 = vpop.f32.mrf.mxu0 }
 0x14b   :  { %v1378_v52 = vmax.f32 %v1373_v48, 0.0  ;;  %v1861_v27 = vld [vmem:[#allocation5 + $0x24] sm:$0x3] }
 0x14c   :  { %v1375_v30 = vpop.f32.mrf.mxu0 }
 0x14d   :  { %v1379_v56 = vpack.c.bf16 %v1378_v52, %v1378_v52 }
 0x14e   :  { %v4119_v32 = vpop.f32.mrf.mxu0 }
 0x14f   :  { %4087 = vmatmul.mubr.msk.bf16.vlgmr.msra.gmra.mxu1 %vm183_vm5, %v1091_v28  ;;  %v1866_v32 = vsel %vm187_vm4, %v1861_v27, 0 }
 0x150   :  { %4097 = vmatpush3.bf16.msra.mxu1 %v1194_v31  ;;  %4098 = vmatprep.mubr.msk.bf16.mxu1 %vm4525_vm1, %v4524_v0  ;;  %v1468_v34 = vpop.f32.mrf.mxu0 }
 0x151   :  { %4108 = vmatprep.subr.bf16.mxu1 %v4524_v0  ;;  %v1469_v57 = vadd.f32 %v4811_v44, %v1468_v34 }
 0x152   :  { %v4130_v36 = vpop.f32.mrf.mxu0 }
 0x153   :  { %v1474_v61 = vmax.f32 %v1469_v57, 0.0  ;;  %v1957_v36 = vld [vmem:[#allocation5 + $0x26] sm:$0x3] }
 0x154   :  { %v1471_v39 = vpop.f32.mrf.mxu0 }
 0x155   :  { %v1475_v2 = vpack.c.bf16 %v1474_v61, %v1474_v61 }
 0x156   :  { %v4131_v41 = vpop.f32.mrf.mxu0 }
 0x157   :  { %4099 = vmatmul.mubr.msk.bf16.vlgmr.msra.gmra.mxu1 %vm183_vm5, %v1187_v37  ;;  %v1962_v41 = vsel %vm187_vm4, %v1957_v36, 0 }
 0x158   :  { %4109 = vmatpush3.bf16.msra.mxu1 %v1290_v40  ;;  %4110 = vmatprep.mubr.msk.bf16.mxu1 %vm4525_vm1, %v4524_v0  ;;  %v1564_v43 = vpop.f32.mrf.mxu0 }
 0x159   :  { %4120 = vmatprep.subr.bf16.mxu1 %v4524_v0  ;;  %v1565_v3 = vadd.f32 %v4811_v44, %v1564_v43 }
 0x15a   :  { %v4142_v46 = vpop.f32.mrf.mxu0 }
 0x15b   :  { %v1570_v5 = vmax.f32 %v1565_v3, 0.0  ;;  %v2053_v46 = vld [vmem:[#allocation5 + $0x28] sm:$0x3] }
 0x15c   :  { %v1567_v49 = vpop.f32.mrf.mxu0 }
 0x15d   :  { %v1571_v11 = vpack.c.bf16 %v1570_v5, %v1570_v5 }
 0x15e   :  { %v4143_v51 = vpop.f32.mrf.mxu0 }
 0x15f   :  { %4111 = vmatmul.mubr.msk.bf16.vlgmr.msra.gmra.mxu1 %vm183_vm5, %v1283_v47  ;;  %v2058_v51 = vsel %vm187_vm4, %v2053_v46, 0 }
 0x160   :  { %4121 = vmatpush3.bf16.msra.mxu1 %v1386_v50  ;;  %4122 = vmatprep.mubr.msk.bf16.mxu1 %vm4525_vm1, %v4524_v0  ;;  %v1660_v53 = vpop.f32.mrf.mxu0 }
 0x161   :  { %4132 = vmatprep.subr.bf16.mxu1 %v4524_v0  ;;  %v1661_v12 = vadd.f32 %v4811_v44, %v1660_v53 }
 0x162   :  { %v4154_v55 = vpop.f32.mrf.mxu0 }
 0x163   :  { %v1666_v16 = vmax.f32 %v1661_v12, 0.0  ;;  %v2149_v55 = vld [vmem:[#allocation5 + $0x2a] sm:$0x3] }
 0x164   :  { %v1663_v58 = vpop.f32.mrf.mxu0 }
 0x165   :  { %v1667_v20 = vpack.c.bf16 %v1666_v16, %v1666_v16 }
 0x166   :  { %v4155_v60 = vpop.f32.mrf.mxu0 }
 0x167   :  { %4123 = vmatmul.mubr.msk.bf16.vlgmr.msra.gmra.mxu1 %vm183_vm5, %v1379_v56  ;;  %v2154_v60 = vsel %vm187_vm4, %v2149_v55, 0 }
 0x168   :  { %4133 = vmatpush3.bf16.msra.mxu1 %v1482_v59  ;;  %4134 = vmatprep.mubr.msk.bf16.mxu1 %vm4525_vm1, %v4524_v0  ;;  %v1756_v62 = vpop.f32.mrf.mxu0 }
 0x169   :  { %4144 = vmatprep.subr.bf16.mxu1 %v4524_v0  ;;  %v1757_v21 = vadd.f32 %v4811_v44, %v1756_v62 }
 0x16a   :  { %v4166_v1 = vpop.f32.mrf.mxu0 }
 0x16b   :  { %v1762_v25 = vmax.f32 %v1757_v21, 0.0  ;;  %v2245_v1 = vld [vmem:[#allocation5 + $0x2c] sm:$0x3] }
 0x16c   :  { %v1759_v4 = vpop.f32.mrf.mxu0 }
 0x16d   :  { %v1763_v29 = vpack.c.bf16 %v1762_v25, %v1762_v25 }
 0x16e   :  { %v4167_v7 = vpop.f32.mrf.mxu0 }
 0x16f   :  { %4135 = vmatmul.mubr.msk.bf16.vlgmr.msra.gmra.mxu1 %vm183_vm5, %v1475_v2  ;;  %v2250_v7 = vsel %vm187_vm4, %v2245_v1, 0 }
 0x170   :  { %4145 = vmatpush3.bf16.msra.mxu1 %v1578_v6  ;;  %4146 = vmatprep.mubr.msk.bf16.mxu1 %vm4525_vm1, %v4524_v0  ;;  %v1852_v8 = vpop.f32.mrf.mxu0 }
 0x171   :  { %4156 = vmatprep.subr.bf16.mxu1 %v4524_v0  ;;  %v1853_v30 = vadd.f32 %v4811_v44, %v1852_v8 }
 0x172   :  { %v4178_v10 = vpop.f32.mrf.mxu0 }
 0x173   :  { %v1858_v34 = vmax.f32 %v1853_v30, 0.0  ;;  %v2341_v10 = vld [vmem:[#allocation5 + $0x2e] sm:$0x3] }
 0x174   :  { %v1855_v13 = vpop.f32.mrf.mxu0 }
 0x175   :  { %v1859_v38 = vpack.c.bf16 %v1858_v34, %v1858_v34 }
 0x176   :  { %v4179_v15 = vpop.f32.mrf.mxu0 }
 0x177   :  { %4147 = vmatmul.mubr.msk.bf16.vlgmr.msra.gmra.mxu1 %vm183_vm5, %v1571_v11  ;;  %v2346_v15 = vsel %vm187_vm4, %v2341_v10, 0 }
 0x178   :  { %4157 = vmatpush3.bf16.msra.mxu1 %v1674_v14  ;;  %4158 = vmatprep.mubr.msk.bf16.mxu1 %vm4525_vm1, %v4524_v0  ;;  %v1948_v17 = vpop.f32.mrf.mxu0 }
 0x179   :  { %4168 = vmatprep.subr.bf16.mxu1 %v4524_v0  ;;  %v1949_v39 = vadd.f32 %v4811_v44, %v1948_v17 }
 0x17a   :  { %v4190_v19 = vpop.f32.mrf.mxu0 }
 0x17b   :  { %v1954_v43 = vmax.f32 %v1949_v39, 0.0  ;;  %v2437_v19 = vld [vmem:[#allocation5 + $0x30] sm:$0x3]  ;;  %v2629_v39 = vld [vmem:[#allocation5 + $0x34] sm:$0x3] }
 0x17c   :  { %v1951_v22 = vpop.f32.mrf.mxu0  ;;  %v2634_v46 = vsel %vm187_vm4, %v2629_v39, 0 }
 0x17d   :  { %v1955_v48 = vpack.c.bf16 %v1954_v43, %v1954_v43 }
 0x17e   :  { %v4191_v24 = vpop.f32.mrf.mxu0 }
 0x17f   :  { %4159 = vmatmul.mubr.msk.bf16.vlgmr.msra.gmra.mxu1 %vm183_vm5, %v1667_v20  ;;  %v2442_v24 = vsel %vm187_vm4, %v2437_v19, 0  ;;  %v2917_v19 = vld [vmem:[#allocation5 + $0x3a] sm:$0x3] }
 0x180   :  { %4169 = vmatpush3.bf16.msra.mxu1 %v1770_v23  ;;  %4170 = vmatprep.mubr.msk.bf16.mxu1 %vm4525_vm1, %v4524_v0  ;;  %v2044_v26 = vpop.f32.mrf.mxu0 }
 0x181   :  { %4180 = vmatprep.subr.bf16.mxu1 %v4524_v0  ;;  %v2045_v49 = vadd.f32 %v4811_v44, %v2044_v26 }
 0x182   :  { %v4202_v28 = vpop.f32.mrf.mxu0 }
 0x183   :  { %v2050_v53 = vmax.f32 %v2045_v49, 0.0  ;;  %v2533_v28 = vld [vmem:[#allocation5 + $0x32] sm:$0x3] }
 0x184   :  { %v2047_v31 = vpop.f32.mrf.mxu0 }
 0x185   :  { %v2051_v57 = vpack.c.bf16 %v2050_v53, %v2050_v53 }
 0x186   :  { %v4203_v33 = vpop.f32.mrf.mxu0 }
 0x187   :  { %4171 = vmatmul.mubr.msk.bf16.vlgmr.msra.gmra.mxu1 %vm183_vm5, %v1763_v29  ;;  %v2538_v33 = vsel %vm187_vm4, %v2533_v28, 0 }
 0x188   :  { %4181 = vmatpush3.bf16.msra.mxu1 %v1866_v32  ;;  %4182 = vmatprep.mubr.msk.bf16.mxu1 %vm4525_vm1, %v4524_v0  ;;  %v2140_v35 = vpop.f32.mrf.mxu0 }
 0x189   :  { %4192 = vmatprep.subr.bf16.mxu1 %v4524_v0  ;;  %v2141_v58 = vadd.f32 %v4811_v44, %v2140_v35 }
 0x18a   :  { %v4214_v37 = vpop.f32.mrf.mxu0 }
 0x18b   :  { %v2146_v62 = vmax.f32 %v2141_v58, 0.0 }
 0x18c   :  { %v2143_v40 = vpop.f32.mrf.mxu0 }
 0x18d   :  { %v2147_v3 = vpack.c.bf16 %v2146_v62, %v2146_v62 }
 0x18e   :  { %v4215_v42 = vpop.f32.mrf.mxu0 }
 0x18f   :  { %4183 = vmatmul.mubr.msk.bf16.vlgmr.msra.gmra.mxu1 %vm183_vm5, %v1859_v38 }
 0x190   :  { %4193 = vmatpush3.bf16.msra.mxu1 %v1962_v41  ;;  %4194 = vmatprep.mubr.msk.bf16.mxu1 %vm4525_vm1, %v4524_v0  ;;  %v2236_v45 = vpop.f32.mrf.mxu0 }
 0x191   :  { %4204 = vmatprep.subr.bf16.mxu1 %v4524_v0  ;;  %v2237_v4 = vadd.f32 %v4811_v44, %v2236_v45 }
 0x192   :  { %v4226_v47 = vpop.f32.mrf.mxu0 }
 0x193   :  { %v2242_v8 = vmax.f32 %v2237_v4, 0.0 }
 0x194   :  { %v2239_v50 = vpop.f32.mrf.mxu0 }
 0x195   :  { %v2243_v12 = vpack.c.bf16 %v2242_v8, %v2242_v8 }
 0x196   :  { %v4227_v52 = vpop.f32.mrf.mxu0 }
 0x197   :  { %4195 = vmatmul.mubr.msk.bf16.vlgmr.msra.gmra.mxu1 %vm183_vm5, %v1955_v48 }
 0x198   :  { %4205 = vmatpush3.bf16.msra.mxu1 %v2058_v51  ;;  %4206 = vmatprep.mubr.msk.bf16.mxu1 %vm4525_vm1, %v4524_v0  ;;  %v2332_v54 = vpop.f32.mrf.mxu0 }
 0x199   :  { %4216 = vmatprep.subr.bf16.mxu1 %v4524_v0  ;;  %v2333_v13 = vadd.f32 %v4811_v44, %v2332_v54  ;;  %v2725_v54 = vld [vmem:[#allocation5 + $0x36] sm:$0x3] }
 0x19a   :  { %v4238_v56 = vpop.f32.mrf.mxu0 }
 0x19b   :  { %v2338_v17 = vmax.f32 %v2333_v13, 0.0 }
 0x19c   :  { %v2335_v59 = vpop.f32.mrf.mxu0 }
 0x19d   :  { %v2339_v21 = vpack.c.bf16 %v2338_v17, %v2338_v17 }
 0x19e   :  { %v4239_v61 = vpop.f32.mrf.mxu0 }
 0x19f   :  { %4207 = vmatmul.mubr.msk.bf16.vlgmr.msra.gmra.mxu1 %vm183_vm5, %v2051_v57 }
 0x1a0   :  { %4217 = vmatpush3.bf16.msra.mxu1 %v2154_v60  ;;  %4218 = vmatprep.mubr.msk.bf16.mxu1 %vm4525_vm1, %v4524_v0  ;;  %v2428_v63 = vpop.f32.mrf.mxu0  ;;  %v2730_v60 = vsel %vm187_vm4, %v2725_v54, 0 }
 0x1a1   :  { %4228 = vmatprep.subr.bf16.mxu1 %v4524_v0  ;;  %v2429_v22 = vadd.f32 %v4811_v44, %v2428_v63 }
 0x1a2   :  { %v4250_v2 = vpop.f32.mrf.mxu0 }
 0x1a3   :  { %v2434_v26 = vmax.f32 %v2429_v22, 0.0 }
 0x1a4   :  { %v2431_v6 = vpop.f32.mrf.mxu0 }
 0x1a5   :  { %v2435_v30 = vpack.c.bf16 %v2434_v26, %v2434_v26  ;;  %v2821_v6 = vld [vmem:[#allocation5 + $0x38] sm:$0x3] }
 0x1a6   :  { %v4251_v5 = vpop.f32.mrf.mxu0 }
 0x1a7   :  { %4219 = vmatmul.mubr.msk.bf16.vlgmr.msra.gmra.mxu1 %vm183_vm5, %v2147_v3 }
 0x1a8   :  { %4229 = vmatpush3.bf16.msra.mxu1 %v2250_v7  ;;  %4230 = vmatprep.mubr.msk.bf16.mxu1 %vm4525_vm1, %v4524_v0  ;;  %v2524_v9 = vpop.f32.mrf.mxu0 }
 0x1a9   :  { %4240 = vmatprep.subr.bf16.mxu1 %v4524_v0  ;;  %v2525_v31 = vadd.f32 %v4811_v44, %v2524_v9 }
 0x1aa   :  { %v4262_v11 = vpop.f32.mrf.mxu0 }
 0x1ab   :  { %v2530_v35 = vmax.f32 %v2525_v31, 0.0  ;;  %v2826_v11 = vsel %vm187_vm4, %v2821_v6, 0 }
 0x1ac   :  { %v2527_v14 = vpop.f32.mrf.mxu0 }
 0x1ad   :  { %v2531_v40 = vpack.c.bf16 %v2530_v35, %v2530_v35 }
 0x1ae   :  { %v4263_v16 = vpop.f32.mrf.mxu0 }
 0x1af   :  { %4231 = vmatmul.mubr.msk.bf16.vlgmr.msra.gmra.mxu1 %vm183_vm5, %v2243_v12 }
 0x1b0   :  { %4241 = vmatpush3.bf16.msra.mxu1 %v2346_v15  ;;  %4242 = vmatprep.mubr.msk.bf16.mxu1 %vm4525_vm1, %v4524_v0  ;;  %v2620_v18 = vpop.f32.mrf.mxu0 }
 0x1b1   :  { %4252 = vmatprep.subr.bf16.mxu1 %v4524_v0  ;;  %v2621_v42 = vadd.f32 %v4811_v44, %v2620_v18 }
 0x1b2   :  { %v4274_v20 = vpop.f32.mrf.mxu0 }
 0x1b3   :  { %v2626_v48 = vmax.f32 %v2621_v42, 0.0 }
 0x1b4   :  { %v2623_v23 = vpop.f32.mrf.mxu0 }
 0x1b5   :  { %v2627_v55 = vpack.c.bf16 %v2626_v48, %v2626_v48  ;;  %v3109_v48 = vld [vmem:[#allocation5 + $0x3e] sm:$0x3] }
 0x1b6   :  { %v4275_v25 = vpop.f32.mrf.mxu0  ;;  %v3114_v54 = vsel %vm187_vm4, %v3109_v48, 0 }
 0x1b7   :  { %4243 = vmatmul.mubr.msk.bf16.vlgmr.msra.gmra.mxu1 %vm183_vm5, %v2339_v21  ;;  %v2922_v25 = vsel %vm187_vm4, %v2917_v19, 0 }
 0x1b8   :  { %4253 = vmatpush3.bf16.msra.mxu1 %v2442_v24  ;;  %4254 = vmatprep.mubr.msk.bf16.mxu1 %vm4525_vm1, %v4524_v0  ;;  %v2716_v27 = vpop.f32.mrf.mxu0 }
 0x1b9   :  { %4264 = vmatprep.subr.bf16.mxu1 %v4524_v0  ;;  %v2717_v57 = vadd.f32 %v4811_v44, %v2716_v27 }
 0x1ba   :  { %v4286_v29 = vpop.f32.mrf.mxu0 }
 0x1bb   :  { %v2722_v62 = vmax.f32 %v2717_v57, 0.0 }
 0x1bc   :  { %v2719_v32 = vpop.f32.mrf.mxu0 }
 0x1bd   :  { %v2723_v7 = vpack.c.bf16 %v2722_v62, %v2722_v62  ;;  %v3205_v62 = vld [vmem:[#allocation5 + $0x40] sm:$0x3] }
 0x1be   :  { %v4287_v34 = vpop.f32.mrf.mxu0  ;;  %v3210_v6 = vsel %vm187_vm4, %v3205_v62, 0 }
 0x1bf   :  { %v225_v36 = vpop.f32.mrf.mxu1  ;;  %4255 = vmatmul.mubr.msk.bf16.vlgmr.msra.gmra.mxu1 %vm183_vm5, %v2435_v30 }
 0x1c0   :  { %4265 = vmatpush3.bf16.msra.mxu1 %v2538_v33  ;;  %4266 = vmatprep.mubr.msk.bf16.mxu1 %vm4525_vm1, %v4524_v0  ;;  %v3013_v33 = vld [vmem:[#allocation5 + $0x3c] sm:$0x3] }
 0x1c1   :  { %v3974_v37 = vpop.f32.mrf.mxu1  ;;  %4276 = vmatprep.subr.bf16.mxu1 %v4524_v0  ;;  %v2812_v38 = vpop.f32.mrf.mxu0  ;;  %v3018_v39 = vsel %vm187_vm4, %v3013_v33, 0 }
 0x1c2   :  { %v2813_v8 = vadd.f32 %v4811_v44, %v2812_v38 }
 0x1c3   :  { %v228_v41 = vpop.f32.mrf.mxu1  ;;  %v4298_v43 = vpop.f32.mrf.mxu0 }
 0x1c4   :  { %v2818_v13 = vmax.f32 %v2813_v8, 0.0 }
 0x1c5   :  { %v3975_v45 = vpop.f32.mrf.mxu1  ;;  %v2815_v47 = vpop.f32.mrf.mxu0 }
 0x1c6   :  { %v2819_v20 = vpack.c.bf16 %v2818_v13, %v2818_v13  ;;  %v3301_v13 = vld [vmem:[#allocation5 + $0x42] sm:$0x3] }
 0x1c7   :  { %v271_v49 = vpop.f32.mrf.mxu1  ;;  %4267 = vmatmul.mubr.msk.bf16.vlgmr.msra.gmra.mxu1 %vm183_vm5, %v2531_v40  ;;  %v4299_v50 = vpop.f32.mrf.mxu0  ;;  %v3306_v19 = vsel %vm187_vm4, %v3301_v13, 0  ;;  %v4420_v13 = vld [vmem:[%s5131_s5 + $0x38] sm:$0xff]  }
 0x1c8   :  { %v272_v51 = vadd.f32 %v271_v49, %v225_v36  ;;  %4277 = vmatpush3.bf16.msra.mxu1 %v2634_v46  ;;  %4278 = vmatprep.mubr.msk.bf16.mxu1 %vm4525_vm1, %v4524_v0 }
 0x1c9   :  { %v3980_v52 = vpop.f32.mrf.mxu1  ;;  %4288 = vmatprep.subr.bf16.mxu1 %v4524_v0  ;;  %v2908_v53 = vpop.f32.mrf.mxu0  ;;  %4391 = vmatpush3.bf16.msra.mxu0 %v4420_v13 }
 0x1ca   :  { %v2909_v22 = vadd.f32 %v4811_v44, %v2908_v53  ;;  %4392 = vmatprep.subr.bf16.mxu0 %v4524_v0 }
 0x1cb   :  { %v274_v56 = vpop.f32.mrf.mxu1  ;;  %v4310_v58 = vpop.f32.mrf.mxu0 }
 0x1cc   :  { %v2914_v27 = vmax.f32 %v2909_v22, 0.0 }
 0x1cd   :  { %v3981_v59 = vpop.f32.mrf.mxu1  ;;  %v2911_v61 = vpop.f32.mrf.mxu0 }
 0x1ce   :  { %v2915_v34 = vpack.c.bf16 %v2914_v27, %v2914_v27 }
 0x1cf   :  { %v366_v63 = vpop.f32.mrf.mxu1  ;;  %4279 = vmatmul.mubr.msk.bf16.vlgmr.msra.gmra.mxu1 %vm183_vm5, %v2627_v55  ;;  %v4311_v1 = vpop.f32.mrf.mxu0 }
 0x1d0   :  { %v372_v2 = vadd.f32 %v366_v63, %v272_v51  ;;  %4289 = vmatpush3.bf16.msra.mxu1 %v2730_v60  ;;  %4290 = vmatprep.mubr.msk.bf16.mxu1 %vm4525_vm1, %v4524_v0 }
 0x1d1   :  { %v3992_v3 = vpop.f32.mrf.mxu1  ;;  %4300 = vmatprep.subr.bf16.mxu1 %v4524_v0  ;;  %v3004_v4 = vpop.f32.mrf.mxu0 }
 0x1d2   :  { %v3005_v36 = vadd.f32 %v4811_v44, %v3004_v4 }
 0x1d3   :  { %v369_v5 = vpop.f32.mrf.mxu1  ;;  %v4322_v9 = vpop.f32.mrf.mxu0 }
 0x1d4   :  { %v3010_v41 = vmax.f32 %v3005_v36, 0.0  ;;  %v3493_v36 = vld [vmem:[#allocation5 + $0x46] sm:$0x3] }
 0x1d5   :  { %v3993_v10 = vpop.f32.mrf.mxu1  ;;  %v3007_v12 = vpop.f32.mrf.mxu0 }
 0x1d6   :  { %v3011_v49 = vpack.c.bf16 %v3010_v41, %v3010_v41  ;;  %v3498_v41 = vsel %vm187_vm4, %v3493_v36, 0 }
 0x1d7   :  { %v462_v14 = vpop.f32.mrf.mxu1  ;;  %4291 = vmatmul.mubr.msk.bf16.vlgmr.msra.gmra.mxu1 %vm183_vm5, %v2723_v7  ;;  %v4323_v15 = vpop.f32.mrf.mxu0 }
 0x1d8   :  { %v468_v16 = vadd.f32 %v462_v14, %v372_v2  ;;  %4301 = vmatpush3.bf16.msra.mxu1 %v2826_v11  ;;  %4302 = vmatprep.mubr.msk.bf16.mxu1 %vm4525_vm1, %v4524_v0 }
 0x1d9   :  { %v4004_v17 = vpop.f32.mrf.mxu1  ;;  %4312 = vmatprep.subr.bf16.mxu1 %v4524_v0  ;;  %v3100_v18 = vpop.f32.mrf.mxu0 }
 0x1da   :  { %v3101_v51 = vadd.f32 %v4811_v44, %v3100_v18 }
 0x1db   :  { %v465_v21 = vpop.f32.mrf.mxu1  ;;  %v4334_v23 = vpop.f32.mrf.mxu0 }
 0x1dc   :  { %v3106_v56 = vmax.f32 %v3101_v51, 0.0 }
 0x1dd   :  { %v4005_v24 = vpop.f32.mrf.mxu1  ;;  %v3103_v26 = vpop.f32.mrf.mxu0 }
 0x1de   :  { %v3107_v63 = vpack.c.bf16 %v3106_v56, %v3106_v56  ;;  %v3397_v26 = vld [vmem:[#allocation5 + $0x44] sm:$0x3] }
 0x1df   :  { %v558_v28 = vpop.f32.mrf.mxu1  ;;  %4303 = vmatmul.mubr.msk.bf16.vlgmr.msra.gmra.mxu1 %vm183_vm5, %v2819_v20  ;;  %v4335_v29 = vpop.f32.mrf.mxu0 }
 0x1e0   :  { %v564_v30 = vadd.f32 %v558_v28, %v468_v16  ;;  %4313 = vmatpush3.bf16.msra.mxu1 %v2922_v25  ;;  %4314 = vmatprep.mubr.msk.bf16.mxu1 %vm4525_vm1, %v4524_v0  ;;  %v4432_v28 = vld [vmem:[#allocation2] ss:$0 sm:$0xff] }
 0x1e1   :  { %v4016_v31 = vpop.f32.mrf.mxu1  ;;  %4324 = vmatprep.subr.bf16.mxu1 %v4524_v0  ;;  %v3196_v32 = vpop.f32.mrf.mxu0 }
 0x1e2   :  { %v3197_v2 = vadd.f32 %v4811_v44, %v3196_v32  ;;  %v3402_v31 = vsel %vm187_vm4, %v3397_v26, 0 }
 0x1e3   :  { %v561_v35 = vpop.f32.mrf.mxu1  ;;  %v4346_v37 = vpop.f32.mrf.mxu0 }
 0x1e4   :  { %v3202_v5 = vmax.f32 %v3197_v2, 0.0 }
 0x1e5   :  { %v4017_v38 = vpop.f32.mrf.mxu1  ;;  %v3199_v40 = vpop.f32.mrf.mxu0 }
 0x1e6   :  { %v3203_v14 = vpack.c.bf16 %v3202_v5, %v3202_v5 }
 0x1e7   :  { %v654_v42 = vpop.f32.mrf.mxu1  ;;  %4315 = vmatmul.mubr.msk.bf16.vlgmr.msra.gmra.mxu1 %vm183_vm5, %v2915_v34  ;;  %v4347_v43 = vpop.f32.mrf.mxu0 }
 0x1e8   :  { %v660_v45 = vadd.f32 %v654_v42, %v564_v30  ;;  %4325 = vmatpush3.bf16.msra.mxu1 %v3018_v39  ;;  %4326 = vmatprep.mubr.msk.bf16.mxu1 %vm4525_vm1, %v4524_v0 }
 0x1e9   :  { %v4028_v46 = vpop.f32.mrf.mxu1  ;;  %4336 = vmatprep.subr.bf16.mxu1 %v4524_v0  ;;  %v3292_v47 = vpop.f32.mrf.mxu0 }
 0x1ea   :  { %v3293_v16 = vadd.f32 %v4811_v44, %v3292_v47 }
 0x1eb   :  { %v657_v50 = vpop.f32.mrf.mxu1  ;;  %v4358_v52 = vpop.f32.mrf.mxu0 }
 0x1ec   :  { %v3298_v21 = vmax.f32 %v3293_v16, 0.0 }
 0x1ed   :  { %v4029_v53 = vpop.f32.mrf.mxu1  ;;  %v3295_v55 = vpop.f32.mrf.mxu0 }
 0x1ee   :  { %v3299_v44 = vpack.c.bf16 %v3298_v21, %v3298_v21 }
 0x1ef   :  { %v750_v57 = vpop.f32.mrf.mxu1  ;;  %4327 = vmatmul.mubr.msk.bf16.vlgmr.msra.gmra.mxu1 %vm183_vm5, %v3011_v49  ;;  %v4359_v58 = vpop.f32.mrf.mxu0 }
 0x1f0   :  { %v756_v59 = vadd.f32 %v750_v57, %v660_v45  ;;  %4337 = vmatpush3.bf16.msra.mxu1 %v3114_v54  ;;  %4338 = vmatprep.mubr.msk.bf16.mxu1 %vm4525_vm1, %v4524_v0 }
 0x1f1   :  { %v4040_v60 = vpop.f32.mrf.mxu1  ;;  %4348 = vmatprep.subr.bf16.mxu1 %v4524_v0  ;;  %v3388_v61 = vpop.f32.mrf.mxu0 }
 0x1f2   :  { %v3389_v29 = vadd.f32 %v4432_v28, %v3388_v61 }
 0x1f3   :  { %v753_v1 = vpop.f32.mrf.mxu1  ;;  %v4370_v3 = vpop.f32.mrf.mxu0 }
 0x1f4   :  { %v3394_v32 = vmax.f32 %v3389_v29, 0.0 }
 0x1f5   :  { %v4041_v4 = vpop.f32.mrf.mxu1  ;;  %v3391_v7 = vpop.f32.mrf.mxu0 }
 0x1f6   :  { %v3395_v37 = vpack.c.bf16 %v3394_v32, %v3394_v32 }
 0x1f7   :  { %v846_v8 = vpop.f32.mrf.mxu1  ;;  %4339 = vmatmul.mubr.msk.bf16.vlgmr.msra.gmra.mxu1 %vm183_vm5, %v3107_v63  ;;  %v4371_v9 = vpop.f32.mrf.mxu0 }
 0x1f8   :  { %v852_v10 = vadd.f32 %v846_v8, %v756_v59  ;;  %4349 = vmatpush3.bf16.msra.mxu1 %v3210_v6  ;;  %4350 = vmatprep.mubr.msk.bf16.mxu1 %vm4525_vm1, %v4524_v0 }
 0x1f9   :  { %v4052_v11 = vpop.f32.mrf.mxu1  ;;  %4360 = vmatprep.subr.bf16.mxu1 %v4524_v0  ;;  %v3484_v12 = vpop.f32.mrf.mxu0 }
 0x1fa   :  { %v3485_v39 = vadd.f32 %v4432_v28, %v3484_v12 }
 0x1fb   :  { %v849_v15 = vpop.f32.mrf.mxu1  ;;  %v4382_v17 = vpop.f32.mrf.mxu0 }
 0x1fc   :  { %v3490_v42 = vmax.f32 %v3485_v39, 0.0  ;;  %v4421_v17 = vld [vmem:[%s5131_s5 + $0x30] sm:$0xff]  }
 0x1fd   :  { %v4053_v18 = vpop.f32.mrf.mxu1  ;;  %v3487_v20 = vpop.f32.mrf.mxu0  ;;  %4393 = vmatpush3.bf16.msra.mxu0 %v4421_v17 }
 0x1fe   :  { %v3491_v47 = vpack.c.bf16 %v3490_v42, %v3490_v42  ;;  %4394 = vmatprep.subr.bf16.mxu0 %v4524_v0  ;;  %v4422_v20 = vld [vmem:[%s5131_s5 + $0x28] sm:$0xff]  }
 0x1ff   :  { %v942_v22 = vpop.f32.mrf.mxu1  ;;  %4351 = vmatmul.mubr.msk.bf16.vlgmr.msra.gmra.mxu1 %vm183_vm5, %v3203_v14  ;;  %v4383_v23 = vpop.f32.mrf.mxu0 }
 0x200   :  { %v948_v24 = vadd.f32 %v942_v22, %v852_v10  ;;  %4361 = vmatpush3.bf16.msra.mxu1 %v3306_v19  ;;  %4362 = vmatprep.mubr.msk.bf16.mxu1 %vm4525_vm1, %v4524_v0 }
 0x201   :  { %v4064_v25 = vpop.f32.mrf.mxu1  ;;  %4372 = vmatprep.subr.bf16.mxu1 %v4524_v0  ;;  %4395 = vmatpush3.bf16.msra.mxu0 %v4422_v20 }
 0x202   :  { %4396 = vmatprep.subr.bf16.mxu0 %v4524_v0 }
 0x203   :  { %v945_v27 = vpop.f32.mrf.mxu1 }
 0x205   :  { %v4065_v30 = vpop.f32.mrf.mxu1 }
 0x206   :  { %v4425_v30 = vld [vmem:[%s5131_s5 + $0x10] sm:$0xff]  }
 0x207   :  { %v1038_v33 = vpop.f32.mrf.mxu1  ;;  %4363 = vmatmul.mubr.msk.bf16.vlgmr.msra.gmra.mxu1 %vm183_vm5, %v3299_v44  ;;  %v4424_v44 = vld [vmem:[%s5131_s5 + $0x18] sm:$0xff]  }
 0x208   :  { %v1044_v34 = vadd.f32 %v1038_v33, %v948_v24  ;;  %4373 = vmatpush3.bf16.msra.mxu1 %v3402_v31  ;;  %4374 = vmatprep.mubr.msk.bf16.mxu1 %vm4525_vm1, %v4524_v0  ;;  %v4423_v24 = vld [vmem:[%s5131_s5 + $0x20] sm:$0xff]   ;;  %v4426_v33 = vld [vmem:[%s5131_s5 + $0x8] sm:$0xff]  }
 0x209   :  { %v4076_v35 = vpop.f32.mrf.mxu1  ;;  %4384 = vmatprep.subr.bf16.mxu1 %v4524_v0  ;;  %4397 = vmatpush3.bf16.msra.mxu0 %v4423_v24 }
 0x20a   :  { %4398 = vmatprep.subr.bf16.mxu0 %v4524_v0 }
 0x20b   :  { %v1041_v38 = vpop.f32.mrf.mxu1 }
 0x20d   :  { %v4077_v40 = vpop.f32.mrf.mxu1  ;;  %4399 = vmatpush3.bf16.msra.mxu0 %v4424_v44 }
 0x20e   :  { %4400 = vmatprep.subr.bf16.mxu0 %v4524_v0 }
 0x20f   :  { %v1134_v43 = vpop.f32.mrf.mxu1  ;;  %4375 = vmatmul.mubr.msk.bf16.vlgmr.msra.gmra.mxu1 %vm183_vm5, %v3395_v37  ;;  %v4427_v37 = vld [vmem:[%s5131_s5] sm:$0xff]  }
 0x210   :  { %v1140_v45 = vadd.f32 %v1134_v43, %v1044_v34  ;;  %4385 = vmatpush3.bf16.msra.mxu1 %v3498_v41  ;;  %4386 = vmatprep.mubr.msk.bf16.mxu1 %vm4525_vm1, %v4524_v0 }
 0x211   :  { %v4088_v46 = vpop.f32.mrf.mxu1  ;;  %4401 = vmatpush3.bf16.msra.mxu0 %v4425_v30 }
 0x212   :  { %4402 = vmatprep.subr.bf16.mxu0 %v4524_v0 }
 0x213   :  { %v1137_v48 = vpop.f32.mrf.mxu1 }
 0x215   :  { %v4089_v49 = vpop.f32.mrf.mxu1  ;;  %4403 = vmatpush3.bf16.msra.mxu0 %v4426_v33 }
 0x216   :  { %4404 = vmatprep.subr.bf16.mxu0 %v4524_v0 }
 0x217   :  { %v1230_v50 = vpop.f32.mrf.mxu1  ;;  %4387 = vmatmul.mubr.msk.bf16.vlgmr.msra.gmra.mxu1 %vm183_vm5, %v3491_v47 }
 0x218   :  { %v1236_v51 = vadd.f32 %v1230_v50, %v1140_v45 }
 0x219   :  { %v4100_v52 = vpop.f32.mrf.mxu1  ;;  %4405 = vmatpush3.bf16.msra.mxu0 %v4427_v37 }
 0x21b   :  { %v1233_v53 = vpop.f32.mrf.mxu1 }
 0x21d   :  { %v4101_v54 = vpop.f32.mrf.mxu1 }
 0x21f   :  { %v1326_v55 = vpop.f32.mrf.mxu1 }
 0x220   :  { %v1332_v56 = vadd.f32 %v1326_v55, %v1236_v51 }
 0x221   :  { %v4112_v57 = vpop.f32.mrf.mxu1 }
 0x223   :  { %v1329_v58 = vpop.f32.mrf.mxu1 }
 0x225   :  { %v4113_v59 = vpop.f32.mrf.mxu1 }
 0x227   :  { %v1422_v60 = vpop.f32.mrf.mxu1 }
 0x228   :  { %v1428_v61 = vadd.f32 %v1422_v60, %v1332_v56 }
 0x229   :  { %v4124_v62 = vpop.f32.mrf.mxu1 }
 0x22b   :  { %v1425_v63 = vpop.f32.mrf.mxu1 }
 0x22d   :  { %v4125_v1 = vpop.f32.mrf.mxu1 }
 0x22f   :  { %v1518_v2 = vpop.f32.mrf.mxu1 }
 0x230   :  { %v1524_v3 = vadd.f32 %v1518_v2, %v1428_v61 }
 0x231   :  { %v4136_v4 = vpop.f32.mrf.mxu1 }
 0x233   :  { %v1521_v6 = vpop.f32.mrf.mxu1 }
 0x235   :  { %v4137_v7 = vpop.f32.mrf.mxu1 }
 0x237   :  { %v1614_v5 = vpop.f32.mrf.mxu1 }
 0x238   :  { %v1620_v8 = vadd.f32 %v1614_v5, %v1524_v3 }
 0x239   :  { %v4148_v9 = vpop.f32.mrf.mxu1 }
 0x23b   :  { %v1617_v10 = vpop.f32.mrf.mxu1 }
 0x23d   :  { %v4149_v11 = vpop.f32.mrf.mxu1 }
 0x23f   :  { %v1710_v12 = vpop.f32.mrf.mxu1 }
 0x240   :  { %v1716_v14 = vadd.f32 %v1710_v12, %v1620_v8 }
 0x241   :  { %v4160_v15 = vpop.f32.mrf.mxu1 }
 0x243   :  { %v1713_v16 = vpop.f32.mrf.mxu1 }
 0x245   :  { %v4161_v18 = vpop.f32.mrf.mxu1 }
 0x247   :  { %v1806_v19 = vpop.f32.mrf.mxu1 }
 0x248   :  { %v1812_v21 = vadd.f32 %v1806_v19, %v1716_v14 }
 0x249   :  { %v4172_v22 = vpop.f32.mrf.mxu1 }
 0x24b   :  { %v1809_v23 = vpop.f32.mrf.mxu1 }
 0x24d   :  { %v4173_v25 = vpop.f32.mrf.mxu1 }
 0x24f   :  { %v1902_v26 = vpop.f32.mrf.mxu1 }
 0x250   :  { %v1908_v27 = vadd.f32 %v1902_v26, %v1812_v21 }
 0x251   :  { %v4184_v28 = vpop.f32.mrf.mxu1 }
 0x253   :  { %v1905_v29 = vpop.f32.mrf.mxu1 }
 0x255   :  { %v4185_v31 = vpop.f32.mrf.mxu1 }
 0x257   :  { %v1998_v32 = vpop.f32.mrf.mxu1 }
 0x258   :  { %v2004_v34 = vadd.f32 %v1998_v32, %v1908_v27 }
 0x259   :  { %v4196_v35 = vpop.f32.mrf.mxu1 }
 0x25b   :  { %v2001_v36 = vpop.f32.mrf.mxu1 }
 0x25d   :  { %v4197_v38 = vpop.f32.mrf.mxu1 }
 0x25f   :  { %v2094_v39 = vpop.f32.mrf.mxu1 }
 0x260   :  { %v2100_v40 = vadd.f32 %v2094_v39, %v2004_v34 }
 0x261   :  { %v4208_v41 = vpop.f32.mrf.mxu1 }
 0x263   :  { %v2097_v42 = vpop.f32.mrf.mxu1 }
 0x265   :  { %v4209_v43 = vpop.f32.mrf.mxu1 }
 0x267   :  { %v2190_v45 = vpop.f32.mrf.mxu1 }
 0x268   :  { %v2196_v46 = vadd.f32 %v2190_v45, %v2100_v40 }
 0x269   :  { %v4220_v47 = vpop.f32.mrf.mxu1 }
 0x26b   :  { %v2193_v48 = vpop.f32.mrf.mxu1 }
 0x26d   :  { %v4221_v49 = vpop.f32.mrf.mxu1 }
 0x26f   :  { %v2286_v50 = vpop.f32.mrf.mxu1 }
 0x270   :  { %v2292_v51 = vadd.f32 %v2286_v50, %v2196_v46 }
 0x271   :  { %v4232_v0 = vpop.f32.mrf.mxu1 }
 0x272   :  { %v3794_v0 = vld [vmem:[#allocation7] ss:$0 sm:$0xff] }
 0x273   :  { %v2289_v52 = vpop.f32.mrf.mxu1 }
 0x275   :  { %v4233_v53 = vpop.f32.mrf.mxu1 }
 0x277   :  { %v2382_v54 = vpop.f32.mrf.mxu1 }
 0x278   :  { %v2388_v55 = vadd.f32 %v2382_v54, %v2292_v51 }
 0x279   :  { %v4244_v56 = vpop.f32.mrf.mxu1 }
 0x27b   :  { %v2385_v57 = vpop.f32.mrf.mxu1 }
 0x27d   :  { %v4245_v58 = vpop.f32.mrf.mxu1 }
 0x27f   :  { %v2478_v59 = vpop.f32.mrf.mxu1 }
 0x280   :  { %v2484_v60 = vadd.f32 %v2478_v59, %v2388_v55  ;;  %v3795_v59 = vld [vmem:[%s5132_s6] ss:$0 sm:$0xff] }
 0x281   :  { %v4256_v61 = vpop.f32.mrf.mxu1 }
 0x283   :  { %v2481_v62 = vpop.f32.mrf.mxu1 }
 0x285   :  { %v4257_v63 = vpop.f32.mrf.mxu1 }
 0x287   :  { %v2574_v1 = vpop.f32.mrf.mxu1 }
 0x288   :  { %v2580_v31 = vadd.f32 %v2574_v1, %v2484_v60 }
 0x289   :  { %v4268_v2 = vpop.f32.mrf.mxu1 }
 0x28b   :  { %v2577_v3 = vpop.f32.mrf.mxu1 }
 0x28d   :  { %v4269_v4 = vpop.f32.mrf.mxu1 }
 0x28f   :  { %v2670_v6 = vpop.f32.mrf.mxu1 }
 0x290   :  { %v2676_v33 = vadd.f32 %v2670_v6, %v2580_v31 }
 0x291   :  { %v4280_v7 = vpop.f32.mrf.mxu1 }
 0x293   :  { %v2673_v5 = vpop.f32.mrf.mxu1 }
 0x295   :  { %v4281_v8 = vpop.f32.mrf.mxu1 }
 0x297   :  { %v2766_v9 = vpop.f32.mrf.mxu1 }
 0x298   :  { %v2772_v35 = vadd.f32 %v2766_v9, %v2676_v33 }
 0x299   :  { %v4292_v10 = vpop.f32.mrf.mxu1 }
 0x29b   :  { %v2769_v11 = vpop.f32.mrf.mxu1 }
 0x29d   :  { %v4293_v12 = vpop.f32.mrf.mxu1 }
 0x29f   :  { %v2862_v13 = vpop.f32.mrf.mxu1 }
 0x2a0   :  { %v2868_v37 = vadd.f32 %v2862_v13, %v2772_v35 }
 0x2a1   :  { %v4304_v14 = vpop.f32.mrf.mxu1 }
 0x2a3   :  { %v2865_v15 = vpop.f32.mrf.mxu1 }
 0x2a5   :  { %v4305_v16 = vpop.f32.mrf.mxu1 }
 0x2a7   :  { %v2958_v17 = vpop.f32.mrf.mxu1 }
 0x2a8   :  { %v2964_v39 = vadd.f32 %v2958_v17, %v2868_v37 }
 0x2a9   :  { %v4316_v18 = vpop.f32.mrf.mxu1 }
 0x2ab   :  { %v2961_v19 = vpop.f32.mrf.mxu1 }
 0x2ad   :  { %v4317_v20 = vpop.f32.mrf.mxu1 }
 0x2af   :  { %v3054_v21 = vpop.f32.mrf.mxu1 }
 0x2b0   :  { %v3060_v41 = vadd.f32 %v3054_v21, %v2964_v39 }
 0x2b1   :  { %v4328_v22 = vpop.f32.mrf.mxu1 }
 0x2b3   :  { %v3057_v23 = vpop.f32.mrf.mxu1 }
 0x2b5   :  { %v4329_v24 = vpop.f32.mrf.mxu1 }
 0x2b7   :  { %v3150_v25 = vpop.f32.mrf.mxu1 }
 0x2b8   :  { %v3156_v43 = vadd.f32 %v3150_v25, %v3060_v41 }
 0x2b9   :  { %v4340_v26 = vpop.f32.mrf.mxu1 }
 0x2bb   :  { %v3153_v44 = vpop.f32.mrf.mxu1 }
 0x2bd   :  { %v4341_v27 = vpop.f32.mrf.mxu1 }
 0x2bf   :  { %v3246_v28 = vpop.f32.mrf.mxu1 }
 0x2c0   :  { %v3252_v46 = vadd.f32 %v3246_v28, %v3156_v43 }
 0x2c1   :  { %v4352_v29 = vpop.f32.mrf.mxu1 }
 0x2c3   :  { %v3249_v30 = vpop.f32.mrf.mxu1 }
 0x2c5   :  { %v4353_v32 = vpop.f32.mrf.mxu1 }
 0x2c7   :  { %v3342_v34 = vpop.f32.mrf.mxu1 }
 0x2c8   :  { %v3348_v48 = vadd.f32 %v3342_v34, %v3252_v46 }
 0x2c9   :  { %v4364_v36 = vpop.f32.mrf.mxu1 }
 0x2cb   :  { %v3345_v38 = vpop.f32.mrf.mxu1 }
 0x2cd   :  { %v4365_v40 = vpop.f32.mrf.mxu1 }
 0x2cf   :  { %v3438_v42 = vpop.f32.mrf.mxu1 }
 0x2d0   :  { %v3444_v50 = vadd.f32 %v3438_v42, %v3348_v48 }
 0x2d1   :  { %v4376_v45 = vpop.f32.mrf.mxu1 }
 0x2d3   :  { %v3441_v47 = vpop.f32.mrf.mxu1 }
 0x2d5   :  { %v4377_v49 = vpop.f32.mrf.mxu1 }
 0x2d7   :  { %v3534_v51 = vpop.f32.mrf.mxu1 }
 0x2d8   :  { %v3540_v52 = vadd.f32 %v3534_v51, %v3444_v50 }
 0x2d9   :  { %v4388_v53 = vpop.f32.mrf.mxu1 }
 0x2da   :  { %v3548_v54 = vadd.f32 %v3794_v0, %v3540_v52 }
 0x2db   :  { %v3537_v55 = vpop.f32.mrf.mxu1 }
 0x2dc   :  { %v3549_v56 = vmax.f32 %v3548_v54, 0.0 }
 0x2dd   :  { %v4389_v57 = vpop.f32.mrf.mxu1 }
 0x2de   :  { %v3550_v58 = vpack.c.bf16 %v3549_v56, %v3549_v56 }
 0x2e0   :  { %4407 = vmatmul.mubr.bf16.vlgmr.msra.gmra.mxu0 %v3550_v58 }
 0x3a0   :  { %v3656_v60 = vpop.f32.mrf.mxu0 }
 0x3a1   :  { %v3657_v61 = vadd.f32 %v3795_v59, %v3656_v60 }
 0x3a2   :  { %v4408_v62 = vpop.f32.mrf.mxu0 }
 0x3a3   :  { %v3804_v63 = vmul.f32 -1.442695, %v3657_v61 }
 0x3a4   :  { %v3659_v1 = vpop.f32.mrf.mxu0 }
 0x3a5   :  { %4428 = vpow2.f32 %v3804_v63 }
 0x3a6   :  { %v4409_v2 = vpop.f32.mrf.mxu0 }
 0x3b2   :  { %v4429_v3 = vpop.eup %4428 }
 0x3b3   :  { %v3665_v4 = vadd.f32 1.0, %v4429_v3 }
 0x3b5   :  { %4430 = vrcp.f32 %v3665_v4 }
 0x3c2   :  { %v4431_v6 = vpop.eup %4430 }
 0x3c3   :  { %3668 = vst [vmem:[#allocation8] sm:$0x3] %v4431_v6 }
 0x3c4   :  { %4504 = shalt.err (!%p4501_p5)
}
 0x3c5   :  { %3678 = dma.vmem_to_hbm [thread:$0]  %s3676_s26, 32, %s5133_s7, [#allocation4]  }
 0x3c6   :  { %4517 = dma.done.wait [#allocation4], 32  }
 0x3c7   :  { %4518 = vsyncadd [#allocation4], 4294967264 }
 0x3c8   :  { %3682 = vsyncpa [#allocation3], 1 }
 0x3c9   :  { %3683 = vsyncpa [#allocation6], 1 }
 0x3ca   :  { %3684 = vsyncpa [#allocation4], 1 }

</bundles_post_ra>
